<compile_context>
chip_gen: v7x
topology: tpu7x:2x2x1
jax: 0.10.0
libtpu: 0.0.40
codegen_flags: <defaults>
</compile_context>

<pallas_src>
import math

import jax
import jax.numpy as jnp
from jax import lax
from jax.experimental import pallas as pl
from jax.experimental.pallas import tpu as pltpu


# ----------------------------------------------------------------------------
# Fused CSPBlock kernel (planar layout: activation[h, w*C + ch])
# ----------------------------------------------------------------------------
def _make_csp_kernel(n, H):
    """Kernel body for a CSPBlock with `n` inner GhostConv blocks."""
    num_in = 17 + 5 * n          # x + 5*(cv1, cv2, m_0..m_{n-1}) + 6 (cv3)

    def ghost(inputs, bpw_ref, d_ref, bdw_ref, ppx_ref, pad_ref):
        """One GhostConv on planar activations.

        inputs : list of (activation (H, W*Cin_i), pointwise-weight ref) pairs
                 whose channel concat forms the GhostConv input (the concat is
                 never materialised).
        Returns the planar GhostConv output (H, W*Cout) in standard
        cat([primary, cheap]) channel order.
        """
        # 1x1 conv (+ folded BN) + ReLU6 on the MXU (block-diagonal weight).
        p = bpw_ref[...]
        for a, b_ref in inputs:
            p = p + jnp.dot(a, b_ref[...], preferred_element_type=jnp.float32)
        p = jnp.clip(p, 0.0, 6.0)                                  # (H, W*Cq)

        # Depthwise 3x3 (+ folded BN) + ReLU6 as three banded matmuls.  The
        # scratch provides the +/-1 row halo (rows 0 and H+1 stay zero); the
        # horizontal halo is folded into the band matrices.
        pad_ref[1:H + 1, :] = p
        d = d_ref[...]                                             # (3, W*Cq, W*Cout)
        acc = jnp.dot(p, d[1], preferred_element_type=jnp.float32)             # dh = 0
        acc = acc + jnp.dot(pad_ref[0:H, :], d[0],
                            preferred_element_type=jnp.float32)                # dh = -1
        acc = acc + jnp.dot(pad_ref[2:H + 2, :], d[2],
                            preferred_element_type=jnp.float32)                # dh = +1
        cx = jnp.clip(acc + bdw_ref[...], 0.0, 6.0)    # zero in the primary columns

        # Scatter the primary half into its channel columns and add the cheap
        # half (disjoint columns) -> standard concat order, no lane shuffles.
        return jnp.dot(p, ppx_ref[...], preferred_element_type=jnp.float32) + cx

    def kernel(*refs):
        x_ref = refs[0]
        o_ref = refs[num_in]
        pad_q_ref = refs[num_in + 1]     # row-halo scratch for cv1 / cv2 / m
        pad_r_ref = refs[num_in + 2]     # row-halo scratch for cv3

        # Zero only the two halo rows of each scratch (interiors are fully
        # overwritten by every stage) -- no full-buffer zero fill.
        for pref in (pad_q_ref, pad_r_ref):
            z = jnp.zeros((1, pref.shape[1]), jnp.float32)
            pref[0:1, :] = z
            pref[H + 1:H + 2, :] = z

        wc = x_ref.shape[2]
        x_pl = x_ref[...].reshape(H, wc).astype(jnp.float32)

        i = 1
        y1 = ghost([(x_pl, refs[i])], *refs[i + 1:i + 5], pad_q_ref)   # cv1
        i += 5
        y2 = ghost([(x_pl, refs[i])], *refs[i + 1:i + 5], pad_q_ref)   # cv2
        i += 5
        for _ in range(n):                                             # self.m chain
            y1 = ghost([(y1, refs[i])], *refs[i + 1:i + 5], pad_q_ref)
            i += 5
        # cv3 consumes the virtual concat([y1, y2], channel): split pointwise.
        out = ghost([(y1, refs[i]), (y2, refs[i + 1])],
                    *refs[i + 2:i + 6], pad_r_ref)
        o_ref[...] = out.reshape(1, H, wc).astype(o_ref.dtype)

    return kernel


# ----------------------------------------------------------------------------
# Host-side parameter planarisation (done once per (params, W) in a real model)
# ----------------------------------------------------------------------------
def _planar_pw(w_pw, W):
    """1x1-conv weight (Cin, Cout) -> planar block-diagonal (W*Cin, W*Cout)."""
    return jnp.kron(jnp.eye(W, dtype=jnp.float32), w_pw.astype(jnp.float32))


def _planar_ghost_tail(p, W):
    """Planar GhostConv pieces that do not depend on the pointwise input split.

    Returns (bpw, D, bdw, Ppx):
      bpw (1, W*Cq)         pointwise bias, tiled per pixel
      D   (3, W*Cq, W*Cout) banded depthwise matrices (one per row offset);
                            taps land in the cheap channel columns and the
                            horizontal zero padding is implicit in the band
      bdw (1, W*Cout)       depthwise bias in the cheap columns, 0 elsewhere
      Ppx (W*Cq, W*Cout)    scatter of the primary half into its channel columns
    """
    assert p["dw_w"] is not None, "GhostConv cheap branch required (even c_out)"
    b_pw = p["pw_b"].astype(jnp.float32)
    t_dw = p["dw_w"].astype(jnp.float32)     # (9, Cq) row-major over (dh, dw)
    b_dw = p["dw_b"].astype(jnp.float32)
    cq = t_dw.shape[1]
    eye_w = jnp.eye(W, dtype=jnp.float32)
    zq = jnp.zeros((cq, cq), jnp.float32)

    bpw = jnp.tile(b_pw, W).reshape(1, W * cq)
    ppx = jnp.kron(eye_w,
                   jnp.concatenate([jnp.eye(cq, dtype=jnp.float32), zq], axis=1))
    d_list = []
    for dh in range(3):
        d_dh = jnp.zeros((W * cq, W * 2 * cq), jnp.float32)
        for dw in range(3):
            g = jnp.concatenate([zq, jnp.diag(t_dw[dh * 3 + dw])], axis=1)
            d_dh = d_dh + jnp.kron(jnp.eye(W, k=1 - dw, dtype=jnp.float32), g)
        d_list.append(d_dh)
    d = jnp.stack(d_list)
    bdw = jnp.tile(jnp.concatenate([jnp.zeros((cq,), jnp.float32), b_dw]),
                   W).reshape(1, W * 2 * cq)
    return bpw, d, bdw, ppx


def _planar_ghost(p, W):
    return (_planar_pw(p["pw_w"], W),) + _planar_ghost_tail(p, W)


def _bcast_spec(shape):
    nd = len(shape)

    def index_map(i):
        return (0,) * nd

    return pl.BlockSpec(tuple(shape), index_map)


# ----------------------------------------------------------------------------
# Kernel wrapper (whole CSPBlock = one pallas_call)
# ----------------------------------------------------------------------------
def csp_block_apply_nhwc(x, params):
    """Fused CSPBlock forward on an NHWC activation."""
    N, H, W, c = x.shape
    assert c % 4 == 0, "CSPBlock channel count must be divisible by 4"
    n = len(params["m"])
    q, r = c // 4, c // 2

    flat = []
    flat += list(_planar_ghost(params["cv1"], W))
    flat += list(_planar_ghost(params["cv2"], W))
    for mp in params["m"]:
        flat += list(_planar_ghost(mp, W))
    w3 = params["cv3"]["pw_w"]                                  # (c, c//2)
    flat += [_planar_pw(w3[:r], W), _planar_pw(w3[r:], W)]      # split for y1 / y2
    flat += list(_planar_ghost_tail(params["cv3"], W))

    x_pl = x.reshape(N, H, W * c)       # free: row-major minor-dim merge

    img_spec = pl.BlockSpec((1, H, W * c), lambda i: (i, 0, 0))
    # TODO(synk): for v6e/v7x at real sizes keep HBM activations in bf16 and
    # add an H-tile grid axis; here f32 whole-image blocks fit VMEM trivially.
    out_pl = pl.pallas_call(
        _make_csp_kernel(n, H),
        out_shape=jax.ShapeDtypeStruct((N, H, W * c), x.dtype),
        grid_spec=pltpu.PrefetchScalarGridSpec(
            num_scalar_prefetch=0,
            grid=(N,),
            in_specs=[img_spec] + [_bcast_spec(a.shape) for a in flat],
            out_specs=img_spec,
            scratch_shapes=[
                pltpu.VMEM((H + 2, W * q), jnp.float32),   # cv1/cv2/m row halo
                pltpu.VMEM((H + 2, W * r), jnp.float32),   # cv3 row halo
            ],
        ),
        compiler_params=pltpu.CompilerParams(dimension_semantics=("parallel",)),
    )(x_pl, *flat)
    return out_pl.reshape(N, H, W, c)


def csp_block_apply(x_nchw, params):
    # NCHW public API (PyTorch convention).  In a full model keep activations
    # NHWC and call csp_block_apply_nhwc directly to avoid per-block transposes.
    x = jnp.transpose(x_nchw, (0, 2, 3, 1))
    return jnp.transpose(csp_block_apply_nhwc(x, params), (0, 3, 1, 2))


# ----------------------------------------------------------------------------
# Deterministic parameter construction (BN folded into convs, eval semantics)
# ----------------------------------------------------------------------------
def _fold_bn(gamma, beta, mean, var, eps=1e-5):
    scale = gamma / jnp.sqrt(var + eps)
    return scale, beta - mean * scale


def _init_bn(key, ch):
    k1, k2, k3, k4 = jax.random.split(key, 4)
    gamma = jax.random.uniform(k1, (ch,), jnp.float32, 0.5, 1.5)
    beta = 0.1 * jax.random.normal(k2, (ch,), jnp.float32)
    mean = 0.1 * jax.random.normal(k3, (ch,), jnp.float32)
    var = jax.random.uniform(k4, (ch,), jnp.float32, 0.5, 1.5)
    return gamma, beta, mean, var


def init_ghost_conv(key, c_in, c_out, ratio=2):
    init_ch = min(c_out, math.ceil(c_out / ratio))
    cheap_ch = c_out - init_ch
    k1, k2, k3, k4 = jax.random.split(key, 4)
    # primary: Conv2d(c_in, init_ch, 1, bias=False) + BN (folded) + ReLU6
    w_pw = jax.random.normal(k1, (c_in, init_ch), jnp.float32) / math.sqrt(c_in)
    s, b = _fold_bn(*_init_bn(k2, init_ch))
    params = {"pw_w": w_pw * s[None, :], "pw_b": b, "dw_w": None, "dw_b": None}
    if cheap_ch == 0:
        return params
    # cheap: Conv2d(init_ch, cheap_ch, 3, 1, 1, groups=init_ch) + BN + ReLU6
    assert cheap_ch == init_ch, "cheap branch must be depthwise (even c_out)"
    w_dw = jax.random.normal(k3, (9, init_ch), jnp.float32) / 3.0
    s2, b2 = _fold_bn(*_init_bn(k4, cheap_ch))
    params["dw_w"] = w_dw * s2[None, :]
    params["dw_b"] = b2
    return params


def init_csp_block(key, c, n=1):
    keys = jax.random.split(key, 3 + n)
    return {
        "cv1": init_ghost_conv(keys[0], c, c // 2),
        "cv2": init_ghost_conv(keys[1], c, c // 2),
        "m": [init_ghost_conv(keys[2 + i], c // 2, c // 2) for i in range(n)],
        "cv3": init_ghost_conv(keys[2 + n], c, c),
    }


# ----------------------------------------------------------------------------
# Pure-JAX reference (for in-script validation)
# ----------------------------------------------------------------------------
def _ref_pointwise(x, w, b):
    y = jnp.einsum("nhwc,cd->nhwd", x, w, precision=lax.Precision.HIGHEST)
    return jnp.clip(y + b, 0.0, 6.0)


def _ref_depthwise(x, w9, b):
    C = x.shape[-1]
    w = w9.reshape(3, 3, 1, C)
    y = lax.conv_general_dilated(
        x, w, (1, 1), "SAME",
        dimension_numbers=("NHWC", "HWIO", "NHWC"),
        feature_group_count=C, precision=lax.Precision.HIGHEST)
    return jnp.clip(y + b, 0.0, 6.0)


def _ref_ghost(x, p):
    px = _ref_pointwise(x, p["pw_w"], p["pw_b"])
    if p["dw_w"] is None:
        return px
    return jnp.concatenate([px, _ref_depthwise(px, p["dw_w"], p["dw_b"])], -1)


def _ref_csp(x_nchw, params):
    x = jnp.transpose(x_nchw, (0, 2, 3, 1))
    y1 = _ref_ghost(x, params["cv1"])
    for mp in params["m"]:
        y1 = _ref_ghost(y1, mp)
    y2 = _ref_ghost(x, params["cv2"])
    out = _ref_ghost(jnp.concatenate([y1, y2], -1), params["cv3"])
    return jnp.transpose(out, (0, 3, 1, 2))


if __name__ == "__main__":
    key = jax.random.PRNGKey(0)
    kx, kp = jax.random.split(key)

    N, C, H, W = 2, 8, 16, 16          # c must be divisible by 4 (cheap branch)
    x = jax.random.normal(kx, (N, C, H, W), jnp.float32)   # NCHW like PyTorch
    params = init_csp_block(kp, C, n=1)

    out = jax.block_until_ready(csp_block_apply(x, params))
    ref = jax.block_until_ready(_ref_csp(x, params))

    assert out.shape == (N, C, H, W), out.shape
    err = float(jnp.max(jnp.abs(out - ref)))
    # Tolerance covers MXU f32 matmul rounding differences vs. the XLA reference.
    assert bool(jnp.allclose(out, ref, atol=2e-3, rtol=2e-3)), \
        f"mismatch vs reference (max abs err = {err})"
    print("KERNEL_OK")
</pallas_src>

<mosaic_0001>
module attributes {stable_mosaic.version = 11 : i64} {
  func.func @kernel(%arg0: i32, %arg1: memref<1x16x128xf32, #tpu.memory_space<vmem>>, %arg2: memref<128x32xf32, #tpu.memory_space<vmem>>, %arg3: memref<1x32xf32, #tpu.memory_space<vmem>>, %arg4: memref<3x32x64xf32, #tpu.memory_space<vmem>>, %arg5: memref<1x64xf32, #tpu.memory_space<vmem>>, %arg6: memref<32x64xf32, #tpu.memory_space<vmem>>, %arg7: memref<128x32xf32, #tpu.memory_space<vmem>>, %arg8: memref<1x32xf32, #tpu.memory_space<vmem>>, %arg9: memref<3x32x64xf32, #tpu.memory_space<vmem>>, %arg10: memref<1x64xf32, #tpu.memory_space<vmem>>, %arg11: memref<32x64xf32, #tpu.memory_space<vmem>>, %arg12: memref<64x32xf32, #tpu.memory_space<vmem>>, %arg13: memref<1x32xf32, #tpu.memory_space<vmem>>, %arg14: memref<3x32x64xf32, #tpu.memory_space<vmem>>, %arg15: memref<1x64xf32, #tpu.memory_space<vmem>>, %arg16: memref<32x64xf32, #tpu.memory_space<vmem>>, %arg17: memref<64x64xf32, #tpu.memory_space<vmem>>, %arg18: memref<64x64xf32, #tpu.memory_space<vmem>>, %arg19: memref<1x64xf32, #tpu.memory_space<vmem>>, %arg20: memref<3x64x128xf32, #tpu.memory_space<vmem>>, %arg21: memref<1x128xf32, #tpu.memory_space<vmem>>, %arg22: memref<64x128xf32, #tpu.memory_space<vmem>>, %arg23: memref<1x16x128xf32, #tpu.memory_space<vmem>>, %arg24: memref<18x32xf32, #tpu.memory_space<vmem>>, %arg25: memref<18x64xf32, #tpu.memory_space<vmem>>) attributes {dimension_semantics = [#tpu.dimension_semantics<parallel>], iteration_bounds = array<i64: 2>, scalar_prefetch = 0 : i64, scratch_operands = 2 : i64, tpu.core_type = #tpu.core_type<tc>, window_params = [{transform_indices = @transform_0, window_bounds = array<i64: 1, 16, 128>}, {pipeline_mode = #tpu.pipeline_mode<synchronous>, transform_indices = @transform_1, window_bounds = array<i64: 128, 32>}, {pipeline_mode = #tpu.pipeline_mode<synchronous>, transform_indices = @transform_2, window_bounds = array<i64: 1, 32>}, {pipeline_mode = #tpu.pipeline_mode<synchronous>, transform_indices = @transform_3, window_bounds = array<i64: 3, 32, 64>}, {pipeline_mode = #tpu.pipeline_mode<synchronous>, transform_indices = @transform_4, window_bounds = array<i64: 1, 64>}, {pipeline_mode = #tpu.pipeline_mode<synchronous>, transform_indices = @transform_5, window_bounds = array<i64: 32, 64>}, {pipeline_mode = #tpu.pipeline_mode<synchronous>, transform_indices = @transform_6, window_bounds = array<i64: 128, 32>}, {pipeline_mode = #tpu.pipeline_mode<synchronous>, transform_indices = @transform_7, window_bounds = array<i64: 1, 32>}, {pipeline_mode = #tpu.pipeline_mode<synchronous>, transform_indices = @transform_8, window_bounds = array<i64: 3, 32, 64>}, {pipeline_mode = #tpu.pipeline_mode<synchronous>, transform_indices = @transform_9, window_bounds = array<i64: 1, 64>}, {pipeline_mode = #tpu.pipeline_mode<synchronous>, transform_indices = @transform_10, window_bounds = array<i64: 32, 64>}, {pipeline_mode = #tpu.pipeline_mode<synchronous>, transform_indices = @transform_11, window_bounds = array<i64: 64, 32>}, {pipeline_mode = #tpu.pipeline_mode<synchronous>, transform_indices = @transform_12, window_bounds = array<i64: 1, 32>}, {pipeline_mode = #tpu.pipeline_mode<synchronous>, transform_indices = @transform_13, window_bounds = array<i64: 3, 32, 64>}, {pipeline_mode = #tpu.pipeline_mode<synchronous>, transform_indices = @transform_14, window_bounds = array<i64: 1, 64>}, {pipeline_mode = #tpu.pipeline_mode<synchronous>, transform_indices = @transform_15, window_bounds = array<i64: 32, 64>}, {pipeline_mode = #tpu.pipeline_mode<synchronous>, transform_indices = @transform_16, window_bounds = array<i64: 64, 64>}, {pipeline_mode = #tpu.pipeline_mode<synchronous>, transform_indices = @transform_17, window_bounds = array<i64: 64, 64>}, {pipeline_mode = #tpu.pipeline_mode<synchronous>, transform_indices = @transform_18, window_bounds = array<i64: 1, 64>}, {pipeline_mode = #tpu.pipeline_mode<synchronous>, transform_indices = @transform_19, window_bounds = array<i64: 3, 64, 128>}, {pipeline_mode = #tpu.pipeline_mode<synchronous>, transform_indices = @transform_20, window_bounds = array<i64: 1, 128>}, {pipeline_mode = #tpu.pipeline_mode<synchronous>, transform_indices = @transform_21, window_bounds = array<i64: 64, 128>}, {transform_indices = @transform_22, window_bounds = array<i64: 1, 16, 128>}]} {
    %cst = arith.constant 0.000000e+00 : f32
    %0 = vector.broadcast %cst : f32 to vector<1x32xf32>
    %c0 = arith.constant 0 : index
    %c0_0 = arith.constant 0 : index
    %1 = vector.load %arg24[%c0, %c0_0] : memref<18x32xf32, #tpu.memory_space<vmem>>, vector<1x32xf32>
    tpu.vector_store %arg24[%c0, %c0_0], %0 {strides = array<i32>} : memref<18x32xf32, #tpu.memory_space<vmem>>, vector<1x32xf32>,
    %c17 = arith.constant 17 : index
    %c0_1 = arith.constant 0 : index
    %2 = vector.load %arg24[%c17, %c0_1] : memref<18x32xf32, #tpu.memory_space<vmem>>, vector<1x32xf32>
    tpu.vector_store %arg24[%c17, %c0_1], %0 {strides = array<i32>} : memref<18x32xf32, #tpu.memory_space<vmem>>, vector<1x32xf32>,
    %cst_2 = arith.constant 0.000000e+00 : f32
    %3 = vector.broadcast %cst_2 : f32 to vector<1x64xf32>
    %c0_3 = arith.constant 0 : index
    %c0_4 = arith.constant 0 : index
    %4 = vector.load %arg25[%c0_3, %c0_4] : memref<18x64xf32, #tpu.memory_space<vmem>>, vector<1x64xf32>
    tpu.vector_store %arg25[%c0_3, %c0_4], %3 {strides = array<i32>} : memref<18x64xf32, #tpu.memory_space<vmem>>, vector<1x64xf32>,
    %c17_5 = arith.constant 17 : index
    %c0_6 = arith.constant 0 : index
    %5 = vector.load %arg25[%c17_5, %c0_6] : memref<18x64xf32, #tpu.memory_space<vmem>>, vector<1x64xf32>
    tpu.vector_store %arg25[%c17_5, %c0_6], %3 {strides = array<i32>} : memref<18x64xf32, #tpu.memory_space<vmem>>, vector<1x64xf32>,
    %c0_7 = arith.constant 0 : index
    %c0_8 = arith.constant 0 : index
    %c0_9 = arith.constant 0 : index
    %6 = vector.load %arg1[%c0_7, %c0_8, %c0_9] : memref<1x16x128xf32, #tpu.memory_space<vmem>>, vector<1x16x128xf32>
    %7 = vector.shape_cast %6 : vector<1x16x128xf32> to vector<16x128xf32>
    %c0_10 = arith.constant 0 : index
    %c0_11 = arith.constant 0 : index
    %8 = vector.load %arg3[%c0_10, %c0_11] : memref<1x32xf32, #tpu.memory_space<vmem>>, vector<1x32xf32>
    %c0_12 = arith.constant 0 : index
    %c0_13 = arith.constant 0 : index
    %9 = vector.load %arg2[%c0_12, %c0_13] : memref<128x32xf32, #tpu.memory_space<vmem>>, vector<128x32xf32>
    %cst_14 = arith.constant dense<0.000000e+00> : vector<16x32xf32>
    %10 = tpu.matmul %7, %9, %cst_14 {dimension_numbers = #tpu.dot_dimension_numbers<[1], [0], [0], [1], [0, 0, 1, 1], [], []>} : vector<16x128xf32>, vector<128x32xf32>, vector<16x32xf32> -> vector<16x32xf32>
    %11 = vector.broadcast %8 : vector<1x32xf32> to vector<16x32xf32>
    %12 = arith.addf %11, %10 : vector<16x32xf32>
    %cst_15 = arith.constant 0.000000e+00 : f32
    %cst_16 = arith.constant 6.000000e+00 : f32
    %13 = vector.broadcast %cst_15 : f32 to vector<16x32xf32>
    %14 = arith.maximumf %13, %12 : vector<16x32xf32>
    %15 = vector.broadcast %cst_16 : f32 to vector<16x32xf32>
    %16 = arith.minimumf %15, %14 : vector<16x32xf32>
    %c1 = arith.constant 1 : index
    %c0_17 = arith.constant 0 : index
    %17 = vector.load %arg24[%c1, %c0_17] : memref<18x32xf32, #tpu.memory_space<vmem>>, vector<16x32xf32>
    tpu.vector_store %arg24[%c1, %c0_17], %16 {strides = array<i32>} : memref<18x32xf32, #tpu.memory_space<vmem>>, vector<16x32xf32>,
    %c0_18 = arith.constant 0 : index
    %c0_19 = arith.constant 0 : index
    %c0_20 = arith.constant 0 : index
    %18 = vector.load %arg4[%c0_18, %c0_19, %c0_20] : memref<3x32x64xf32, #tpu.memory_space<vmem>>, vector<3x32x64xf32>
    %19 = vector.extract_strided_slice %18 {offsets = [1, 0, 0], sizes = [1, 32, 64], strides = [1, 1, 1]} : vector<3x32x64xf32> to vector<1x32x64xf32>
    %20 = vector.shape_cast %19 : vector<1x32x64xf32> to vector<32x64xf32>
    %cst_21 = arith.constant dense<0.000000e+00> : vector<16x64xf32>
    %21 = tpu.matmul %16, %20, %cst_21 {dimension_numbers = #tpu.dot_dimension_numbers<[1], [0], [0], [1], [0, 0, 1, 1], [], []>} : vector<16x32xf32>, vector<32x64xf32>, vector<16x64xf32> -> vector<16x64xf32>
    %c0_22 = arith.constant 0 : index
    %c0_23 = arith.constant 0 : index
    %22 = vector.load %arg24[%c0_22, %c0_23] : memref<18x32xf32, #tpu.memory_space<vmem>>, vector<16x32xf32>
    %23 = vector.extract_strided_slice %18 {offsets = [0, 0, 0], sizes = [1, 32, 64], strides = [1, 1, 1]} : vector<3x32x64xf32> to vector<1x32x64xf32>
    %24 = vector.shape_cast %23 : vector<1x32x64xf32> to vector<32x64xf32>
    %cst_24 = arith.constant dense<0.000000e+00> : vector<16x64xf32>
    %25 = tpu.matmul %22, %24, %cst_24 {dimension_numbers = #tpu.dot_dimension_numbers<[1], [0], [0], [1], [0, 0, 1, 1], [], []>} : vector<16x32xf32>, vector<32x64xf32>, vector<16x64xf32> -> vector<16x64xf32>
    %26 = arith.addf %21, %25 : vector<16x64xf32>
    %c2 = arith.constant 2 : index
    %c0_25 = arith.constant 0 : index
    %27 = vector.load %arg24[%c2, %c0_25] : memref<18x32xf32, #tpu.memory_space<vmem>>, vector<16x32xf32>
    %28 = vector.extract_strided_slice %18 {offsets = [2, 0, 0], sizes = [1, 32, 64], strides = [1, 1, 1]} : vector<3x32x64xf32> to vector<1x32x64xf32>
    %29 = vector.shape_cast %28 : vector<1x32x64xf32> to vector<32x64xf32>
    %cst_26 = arith.constant dense<0.000000e+00> : vector<16x64xf32>
    %30 = tpu.matmul %27, %29, %cst_26 {dimension_numbers = #tpu.dot_dimension_numbers<[1], [0], [0], [1], [0, 0, 1, 1], [], []>} : vector<16x32xf32>, vector<32x64xf32>, vector<16x64xf32> -> vector<16x64xf32>
    %31 = arith.addf %26, %30 : vector<16x64xf32>
    %c0_27 = arith.constant 0 : index
    %c0_28 = arith.constant 0 : index
    %32 = vector.load %arg5[%c0_27, %c0_28] : memref<1x64xf32, #tpu.memory_space<vmem>>, vector<1x64xf32>
    %33 = vector.broadcast %32 : vector<1x64xf32> to vector<16x64xf32>
    %34 = arith.addf %31, %33 : vector<16x64xf32>
    %cst_29 = arith.constant 0.000000e+00 : f32
    %cst_30 = arith.constant 6.000000e+00 : f32
    %35 = vector.broadcast %cst_29 : f32 to vector<16x64xf32>
    %36 = arith.maximumf %35, %34 : vector<16x64xf32>
    %37 = vector.broadcast %cst_30 : f32 to vector<16x64xf32>
    %38 = arith.minimumf %37, %36 : vector<16x64xf32>
    %c0_31 = arith.constant 0 : index
    %c0_32 = arith.constant 0 : index
    %39 = vector.load %arg6[%c0_31, %c0_32] : memref<32x64xf32, #tpu.memory_space<vmem>>, vector<32x64xf32>
    %cst_33 = arith.constant dense<0.000000e+00> : vector<16x64xf32>
    %40 = tpu.matmul %16, %39, %cst_33 {dimension_numbers = #tpu.dot_dimension_numbers<[1], [0], [0], [1], [0, 0, 1, 1], [], []>} : vector<16x32xf32>, vector<32x64xf32>, vector<16x64xf32> -> vector<16x64xf32>
    %41 = arith.addf %40, %38 : vector<16x64xf32>
    %c0_34 = arith.constant 0 : index
    %c0_35 = arith.constant 0 : index
    %42 = vector.load %arg8[%c0_34, %c0_35] : memref<1x32xf32, #tpu.memory_space<vmem>>, vector<1x32xf32>
    %c0_36 = arith.constant 0 : index
    %c0_37 = arith.constant 0 : index
    %43 = vector.load %arg7[%c0_36, %c0_37] : memref<128x32xf32, #tpu.memory_space<vmem>>, vector<128x32xf32>
    %cst_38 = arith.constant dense<0.000000e+00> : vector<16x32xf32>
    %44 = tpu.matmul %7, %43, %cst_38 {dimension_numbers = #tpu.dot_dimension_numbers<[1], [0], [0], [1], [0, 0, 1, 1], [], []>} : vector<16x128xf32>, vector<128x32xf32>, vector<16x32xf32> -> vector<16x32xf32>
    %45 = vector.broadcast %42 : vector<1x32xf32> to vector<16x32xf32>
    %46 = arith.addf %45, %44 : vector<16x32xf32>
    %cst_39 = arith.constant 0.000000e+00 : f32
    %cst_40 = arith.constant 6.000000e+00 : f32
    %47 = vector.broadcast %cst_39 : f32 to vector<16x32xf32>
    %48 = arith.maximumf %47, %46 : vector<16x32xf32>
    %49 = vector.broadcast %cst_40 : f32 to vector<16x32xf32>
    %50 = arith.minimumf %49, %48 : vector<16x32xf32>
    %c1_41 = arith.constant 1 : index
    %c0_42 = arith.constant 0 : index
    %51 = vector.load %arg24[%c1_41, %c0_42] : memref<18x32xf32, #tpu.memory_space<vmem>>, vector<16x32xf32>
    tpu.vector_store %arg24[%c1_41, %c0_42], %50 {strides = array<i32>} : memref<18x32xf32, #tpu.memory_space<vmem>>, vector<16x32xf32>,
    %c0_43 = arith.constant 0 : index
    %c0_44 = arith.constant 0 : index
    %c0_45 = arith.constant 0 : index
    %52 = vector.load %arg9[%c0_43, %c0_44, %c0_45] : memref<3x32x64xf32, #tpu.memory_space<vmem>>, vector<3x32x64xf32>
    %53 = vector.extract_strided_slice %52 {offsets = [1, 0, 0], sizes = [1, 32, 64], strides = [1, 1, 1]} : vector<3x32x64xf32> to vector<1x32x64xf32>
    %54 = vector.shape_cast %53 : vector<1x32x64xf32> to vector<32x64xf32>
    %cst_46 = arith.constant dense<0.000000e+00> : vector<16x64xf32>
    %55 = tpu.matmul %50, %54, %cst_46 {dimension_numbers = #tpu.dot_dimension_numbers<[1], [0], [0], [1], [0, 0, 1, 1], [], []>} : vector<16x32xf32>, vector<32x64xf32>, vector<16x64xf32> -> vector<16x64xf32>
    %c0_47 = arith.constant 0 : index
    %c0_48 = arith.constant 0 : index
    %56 = vector.load %arg24[%c0_47, %c0_48] : memref<18x32xf32, #tpu.memory_space<vmem>>, vector<16x32xf32>
    %57 = vector.extract_strided_slice %52 {offsets = [0, 0, 0], sizes = [1, 32, 64], strides = [1, 1, 1]} : vector<3x32x64xf32> to vector<1x32x64xf32>
    %58 = vector.shape_cast %57 : vector<1x32x64xf32> to vector<32x64xf32>
    %cst_49 = arith.constant dense<0.000000e+00> : vector<16x64xf32>
    %59 = tpu.matmul %56, %58, %cst_49 {dimension_numbers = #tpu.dot_dimension_numbers<[1], [0], [0], [1], [0, 0, 1, 1], [], []>} : vector<16x32xf32>, vector<32x64xf32>, vector<16x64xf32> -> vector<16x64xf32>
    %60 = arith.addf %55, %59 : vector<16x64xf32>
    %c2_50 = arith.constant 2 : index
    %c0_51 = arith.constant 0 : index
    %61 = vector.load %arg24[%c2_50, %c0_51] : memref<18x32xf32, #tpu.memory_space<vmem>>, vector<16x32xf32>
    %62 = vector.extract_strided_slice %52 {offsets = [2, 0, 0], sizes = [1, 32, 64], strides = [1, 1, 1]} : vector<3x32x64xf32> to vector<1x32x64xf32>
    %63 = vector.shape_cast %62 : vector<1x32x64xf32> to vector<32x64xf32>
    %cst_52 = arith.constant dense<0.000000e+00> : vector<16x64xf32>
    %64 = tpu.matmul %61, %63, %cst_52 {dimension_numbers = #tpu.dot_dimension_numbers<[1], [0], [0], [1], [0, 0, 1, 1], [], []>} : vector<16x32xf32>, vector<32x64xf32>, vector<16x64xf32> -> vector<16x64xf32>
    %65 = arith.addf %60, %64 : vector<16x64xf32>
    %c0_53 = arith.constant 0 : index
    %c0_54 = arith.constant 0 : index
    %66 = vector.load %arg10[%c0_53, %c0_54] : memref<1x64xf32, #tpu.memory_space<vmem>>, vector<1x64xf32>
    %67 = vector.broadcast %66 : vector<1x64xf32> to vector<16x64xf32>
    %68 = arith.addf %65, %67 : vector<16x64xf32>
    %cst_55 = arith.constant 0.000000e+00 : f32
    %cst_56 = arith.constant 6.000000e+00 : f32
    %69 = vector.broadcast %cst_55 : f32 to vector<16x64xf32>
    %70 = arith.maximumf %69, %68 : vector<16x64xf32>
    %71 = vector.broadcast %cst_56 : f32 to vector<16x64xf32>
    %72 = arith.minimumf %71, %70 : vector<16x64xf32>
    %c0_57 = arith.constant 0 : index
    %c0_58 = arith.constant 0 : index
    %73 = vector.load %arg11[%c0_57, %c0_58] : memref<32x64xf32, #tpu.memory_space<vmem>>, vector<32x64xf32>
    %cst_59 = arith.constant dense<0.000000e+00> : vector<16x64xf32>
    %74 = tpu.matmul %50, %73, %cst_59 {dimension_numbers = #tpu.dot_dimension_numbers<[1], [0], [0], [1], [0, 0, 1, 1], [], []>} : vector<16x32xf32>, vector<32x64xf32>, vector<16x64xf32> -> vector<16x64xf32>
    %75 = arith.addf %74, %72 : vector<16x64xf32>
    %c0_60 = arith.constant 0 : index
    %c0_61 = arith.constant 0 : index
    %76 = vector.load %arg13[%c0_60, %c0_61] : memref<1x32xf32, #tpu.memory_space<vmem>>, vector<1x32xf32>
    %c0_62 = arith.constant 0 : index
    %c0_63 = arith.constant 0 : index
    %77 = vector.load %arg12[%c0_62, %c0_63] : memref<64x32xf32, #tpu.memory_space<vmem>>, vector<64x32xf32>
    %cst_64 = arith.constant dense<0.000000e+00> : vector<16x32xf32>
    %78 = tpu.matmul %41, %77, %cst_64 {dimension_numbers = #tpu.dot_dimension_numbers<[1], [0], [0], [1], [0, 0, 1, 1], [], []>} : vector<16x64xf32>, vector<64x32xf32>, vector<16x32xf32> -> vector<16x32xf32>
    %79 = vector.broadcast %76 : vector<1x32xf32> to vector<16x32xf32>
    %80 = arith.addf %79, %78 : vector<16x32xf32>
    %cst_65 = arith.constant 0.000000e+00 : f32
    %cst_66 = arith.constant 6.000000e+00 : f32
    %81 = vector.broadcast %cst_65 : f32 to vector<16x32xf32>
    %82 = arith.maximumf %81, %80 : vector<16x32xf32>
    %83 = vector.broadcast %cst_66 : f32 to vector<16x32xf32>
    %84 = arith.minimumf %83, %82 : vector<16x32xf32>
    %c1_67 = arith.constant 1 : index
    %c0_68 = arith.constant 0 : index
    %85 = vector.load %arg24[%c1_67, %c0_68] : memref<18x32xf32, #tpu.memory_space<vmem>>, vector<16x32xf32>
    tpu.vector_store %arg24[%c1_67, %c0_68], %84 {strides = array<i32>} : memref<18x32xf32, #tpu.memory_space<vmem>>, vector<16x32xf32>,
    %c0_69 = arith.constant 0 : index
    %c0_70 = arith.constant 0 : index
    %c0_71 = arith.constant 0 : index
    %86 = vector.load %arg14[%c0_69, %c0_70, %c0_71] : memref<3x32x64xf32, #tpu.memory_space<vmem>>, vector<3x32x64xf32>
    %87 = vector.extract_strided_slice %86 {offsets = [1, 0, 0], sizes = [1, 32, 64], strides = [1, 1, 1]} : vector<3x32x64xf32> to vector<1x32x64xf32>
    %88 = vector.shape_cast %87 : vector<1x32x64xf32> to vector<32x64xf32>
    %cst_72 = arith.constant dense<0.000000e+00> : vector<16x64xf32>
    %89 = tpu.matmul %84, %88, %cst_72 {dimension_numbers = #tpu.dot_dimension_numbers<[1], [0], [0], [1], [0, 0, 1, 1], [], []>} : vector<16x32xf32>, vector<32x64xf32>, vector<16x64xf32> -> vector<16x64xf32>
    %c0_73 = arith.constant 0 : index
    %c0_74 = arith.constant 0 : index
    %90 = vector.load %arg24[%c0_73, %c0_74] : memref<18x32xf32, #tpu.memory_space<vmem>>, vector<16x32xf32>
    %91 = vector.extract_strided_slice %86 {offsets = [0, 0, 0], sizes = [1, 32, 64], strides = [1, 1, 1]} : vector<3x32x64xf32> to vector<1x32x64xf32>
    %92 = vector.shape_cast %91 : vector<1x32x64xf32> to vector<32x64xf32>
    %cst_75 = arith.constant dense<0.000000e+00> : vector<16x64xf32>
    %93 = tpu.matmul %90, %92, %cst_75 {dimension_numbers = #tpu.dot_dimension_numbers<[1], [0], [0], [1], [0, 0, 1, 1], [], []>} : vector<16x32xf32>, vector<32x64xf32>, vector<16x64xf32> -> vector<16x64xf32>
    %94 = arith.addf %89, %93 : vector<16x64xf32>
    %c2_76 = arith.constant 2 : index
    %c0_77 = arith.constant 0 : index
    %95 = vector.load %arg24[%c2_76, %c0_77] : memref<18x32xf32, #tpu.memory_space<vmem>>, vector<16x32xf32>
    %96 = vector.extract_strided_slice %86 {offsets = [2, 0, 0], sizes = [1, 32, 64], strides = [1, 1, 1]} : vector<3x32x64xf32> to vector<1x32x64xf32>
    %97 = vector.shape_cast %96 : vector<1x32x64xf32> to vector<32x64xf32>
    %cst_78 = arith.constant dense<0.000000e+00> : vector<16x64xf32>
    %98 = tpu.matmul %95, %97, %cst_78 {dimension_numbers = #tpu.dot_dimension_numbers<[1], [0], [0], [1], [0, 0, 1, 1], [], []>} : vector<16x32xf32>, vector<32x64xf32>, vector<16x64xf32> -> vector<16x64xf32>
    %99 = arith.addf %94, %98 : vector<16x64xf32>
    %c0_79 = arith.constant 0 : index
    %c0_80 = arith.constant 0 : index
    %100 = vector.load %arg15[%c0_79, %c0_80] : memref<1x64xf32, #tpu.memory_space<vmem>>, vector<1x64xf32>
    %101 = vector.broadcast %100 : vector<1x64xf32> to vector<16x64xf32>
    %102 = arith.addf %99, %101 : vector<16x64xf32>
    %cst_81 = arith.constant 0.000000e+00 : f32
    %cst_82 = arith.constant 6.000000e+00 : f32
    %103 = vector.broadcast %cst_81 : f32 to vector<16x64xf32>
    %104 = arith.maximumf %103, %102 : vector<16x64xf32>
    %105 = vector.broadcast %cst_82 : f32 to vector<16x64xf32>
    %106 = arith.minimumf %105, %104 : vector<16x64xf32>
    %c0_83 = arith.constant 0 : index
    %c0_84 = arith.constant 0 : index
    %107 = vector.load %arg16[%c0_83, %c0_84] : memref<32x64xf32, #tpu.memory_space<vmem>>, vector<32x64xf32>
    %cst_85 = arith.constant dense<0.000000e+00> : vector<16x64xf32>
    %108 = tpu.matmul %84, %107, %cst_85 {dimension_numbers = #tpu.dot_dimension_numbers<[1], [0], [0], [1], [0, 0, 1, 1], [], []>} : vector<16x32xf32>, vector<32x64xf32>, vector<16x64xf32> -> vector<16x64xf32>
    %109 = arith.addf %108, %106 : vector<16x64xf32>
    %c0_86 = arith.constant 0 : index
    %c0_87 = arith.constant 0 : index
    %110 = vector.load %arg19[%c0_86, %c0_87] : memref<1x64xf32, #tpu.memory_space<vmem>>, vector<1x64xf32>
    %c0_88 = arith.constant 0 : index
    %c0_89 = arith.constant 0 : index
    %111 = vector.load %arg17[%c0_88, %c0_89] : memref<64x64xf32, #tpu.memory_space<vmem>>, vector<64x64xf32>
    %cst_90 = arith.constant dense<0.000000e+00> : vector<16x64xf32>
    %112 = tpu.matmul %109, %111, %cst_90 {dimension_numbers = #tpu.dot_dimension_numbers<[1], [0], [0], [1], [0, 0, 1, 1], [], []>} : vector<16x64xf32>, vector<64x64xf32>, vector<16x64xf32> -> vector<16x64xf32>
    %113 = vector.broadcast %110 : vector<1x64xf32> to vector<16x64xf32>
    %114 = arith.addf %113, %112 : vector<16x64xf32>
    %c0_91 = arith.constant 0 : index
    %c0_92 = arith.constant 0 : index
    %115 = vector.load %arg18[%c0_91, %c0_92] : memref<64x64xf32, #tpu.memory_space<vmem>>, vector<64x64xf32>
    %cst_93 = arith.constant dense<0.000000e+00> : vector<16x64xf32>
    %116 = tpu.matmul %75, %115, %cst_93 {dimension_numbers = #tpu.dot_dimension_numbers<[1], [0], [0], [1], [0, 0, 1, 1], [], []>} : vector<16x64xf32>, vector<64x64xf32>, vector<16x64xf32> -> vector<16x64xf32>
    %117 = arith.addf %114, %116 : vector<16x64xf32>
    %cst_94 = arith.constant 0.000000e+00 : f32
    %cst_95 = arith.constant 6.000000e+00 : f32
    %118 = vector.broadcast %cst_94 : f32 to vector<16x64xf32>
    %119 = arith.maximumf %118, %117 : vector<16x64xf32>
    %120 = vector.broadcast %cst_95 : f32 to vector<16x64xf32>
    %121 = arith.minimumf %120, %119 : vector<16x64xf32>
    %c1_96 = arith.constant 1 : index
    %c0_97 = arith.constant 0 : index
    %122 = vector.load %arg25[%c1_96, %c0_97] : memref<18x64xf32, #tpu.memory_space<vmem>>, vector<16x64xf32>
    tpu.vector_store %arg25[%c1_96, %c0_97], %121 {strides = array<i32>} : memref<18x64xf32, #tpu.memory_space<vmem>>, vector<16x64xf32>,
    %c0_98 = arith.constant 0 : index
    %c0_99 = arith.constant 0 : index
    %c0_100 = arith.constant 0 : index
    %123 = vector.load %arg20[%c0_98, %c0_99, %c0_100] : memref<3x64x128xf32, #tpu.memory_space<vmem>>, vector<3x64x128xf32>
    %124 = vector.extract_strided_slice %123 {offsets = [1, 0, 0], sizes = [1, 64, 128], strides = [1, 1, 1]} : vector<3x64x128xf32> to vector<1x64x128xf32>
    %125 = vector.shape_cast %124 : vector<1x64x128xf32> to vector<64x128xf32>
    %cst_101 = arith.constant dense<0.000000e+00> : vector<16x128xf32>
    %126 = tpu.matmul %121, %125, %cst_101 {dimension_numbers = #tpu.dot_dimension_numbers<[1], [0], [0], [1], [0, 0, 1, 1], [], []>} : vector<16x64xf32>, vector<64x128xf32>, vector<16x128xf32> -> vector<16x128xf32>
    %c0_102 = arith.constant 0 : index
    %c0_103 = arith.constant 0 : index
    %127 = vector.load %arg25[%c0_102, %c0_103] : memref<18x64xf32, #tpu.memory_space<vmem>>, vector<16x64xf32>
    %128 = vector.extract_strided_slice %123 {offsets = [0, 0, 0], sizes = [1, 64, 128], strides = [1, 1, 1]} : vector<3x64x128xf32> to vector<1x64x128xf32>
    %129 = vector.shape_cast %128 : vector<1x64x128xf32> to vector<64x128xf32>
    %cst_104 = arith.constant dense<0.000000e+00> : vector<16x128xf32>
    %130 = tpu.matmul %127, %129, %cst_104 {dimension_numbers = #tpu.dot_dimension_numbers<[1], [0], [0], [1], [0, 0, 1, 1], [], []>} : vector<16x64xf32>, vector<64x128xf32>, vector<16x128xf32> -> vector<16x128xf32>
    %131 = arith.addf %126, %130 : vector<16x128xf32>
    %c2_105 = arith.constant 2 : index
    %c0_106 = arith.constant 0 : index
    %132 = vector.load %arg25[%c2_105, %c0_106] : memref<18x64xf32, #tpu.memory_space<vmem>>, vector<16x64xf32>
    %133 = vector.extract_strided_slice %123 {offsets = [2, 0, 0], sizes = [1, 64, 128], strides = [1, 1, 1]} : vector<3x64x128xf32> to vector<1x64x128xf32>
    %134 = vector.shape_cast %133 : vector<1x64x128xf32> to vector<64x128xf32>
    %cst_107 = arith.constant dense<0.000000e+00> : vector<16x128xf32>
    %135 = tpu.matmul %132, %134, %cst_107 {dimension_numbers = #tpu.dot_dimension_numbers<[1], [0], [0], [1], [0, 0, 1, 1], [], []>} : vector<16x64xf32>, vector<64x128xf32>, vector<16x128xf32> -> vector<16x128xf32>
    %136 = arith.addf %131, %135 : vector<16x128xf32>
    %c0_108 = arith.constant 0 : index
    %c0_109 = arith.constant 0 : index
    %137 = vector.load %arg21[%c0_108, %c0_109] : memref<1x128xf32, #tpu.memory_space<vmem>>, vector<1x128xf32>
    %138 = vector.broadcast %137 : vector<1x128xf32> to vector<16x128xf32>
    %139 = arith.addf %136, %138 : vector<16x128xf32>
    %cst_110 = arith.constant 0.000000e+00 : f32
    %cst_111 = arith.constant 6.000000e+00 : f32
    %140 = vector.broadcast %cst_110 : f32 to vector<16x128xf32>
    %141 = arith.maximumf %140, %139 : vector<16x128xf32>
    %142 = vector.broadcast %cst_111 : f32 to vector<16x128xf32>
    %143 = arith.minimumf %142, %141 : vector<16x128xf32>
    %c0_112 = arith.constant 0 : index
    %c0_113 = arith.constant 0 : index
    %144 = vector.load %arg22[%c0_112, %c0_113] : memref<64x128xf32, #tpu.memory_space<vmem>>, vector<64x128xf32>
    %cst_114 = arith.constant dense<0.000000e+00> : vector<16x128xf32>
    %145 = tpu.matmul %121, %144, %cst_114 {dimension_numbers = #tpu.dot_dimension_numbers<[1], [0], [0], [1], [0, 0, 1, 1], [], []>} : vector<16x64xf32>, vector<64x128xf32>, vector<16x128xf32> -> vector<16x128xf32>
    %146 = arith.addf %145, %143 : vector<16x128xf32>
    %147 = vector.shape_cast %146 : vector<16x128xf32> to vector<1x16x128xf32>
    %c0_115 = arith.constant 0 : index
    %c0_116 = arith.constant 0 : index
    %c0_117 = arith.constant 0 : index
    %148 = vector.load %arg23[%c0_115, %c0_116, %c0_117] : memref<1x16x128xf32, #tpu.memory_space<vmem>>, vector<1x16x128xf32>
    tpu.vector_store %arg23[%c0_115, %c0_116, %c0_117], %147 {strides = array<i32>} : memref<1x16x128xf32, #tpu.memory_space<vmem>>, vector<1x16x128xf32>,
    return
  }
  func.func @transform_0(%arg0: i32) -> (i32, i32, i32) {
    %c0_i32 = arith.constant 0 : i32
    %c0_i32_0 = arith.constant 0 : i32
    %c0_i32_1 = arith.constant 0 : i32
    return %arg0, %c0_i32, %c0_i32_0 : i32, i32, i32
  }
  func.func @transform_1(%arg0: i32) -> (i32, i32) {
    %c0_i32 = arith.constant 0 : i32
    %c0_i32_0 = arith.constant 0 : i32
    %c0_i32_1 = arith.constant 0 : i32
    return %c0_i32, %c0_i32_0 : i32, i32
  }
  func.func @transform_2(%arg0: i32) -> (i32, i32) {
    %c0_i32 = arith.constant 0 : i32
    %c0_i32_0 = arith.constant 0 : i32
    %c0_i32_1 = arith.constant 0 : i32
    return %c0_i32, %c0_i32_0 : i32, i32
  }
  func.func @transform_3(%arg0: i32) -> (i32, i32, i32) {
    %c0_i32 = arith.constant 0 : i32
    %c0_i32_0 = arith.constant 0 : i32
    %c0_i32_1 = arith.constant 0 : i32
    %c0_i32_2 = arith.constant 0 : i32
    return %c0_i32, %c0_i32_0, %c0_i32_1 : i32, i32, i32
  }
  func.func @transform_4(%arg0: i32) -> (i32, i32) {
    %c0_i32 = arith.constant 0 : i32
    %c0_i32_0 = arith.constant 0 : i32
    %c0_i32_1 = arith.constant 0 : i32
    return %c0_i32, %c0_i32_0 : i32, i32
  }
  func.func @transform_5(%arg0: i32) -> (i32, i32) {
    %c0_i32 = arith.constant 0 : i32
    %c0_i32_0 = arith.constant 0 : i32
    %c0_i32_1 = arith.constant 0 : i32
    return %c0_i32, %c0_i32_0 : i32, i32
  }
  func.func @transform_6(%arg0: i32) -> (i32, i32) {
    %c0_i32 = arith.constant 0 : i32
    %c0_i32_0 = arith.constant 0 : i32
    %c0_i32_1 = arith.constant 0 : i32
    return %c0_i32, %c0_i32_0 : i32, i32
  }
  func.func @transform_7(%arg0: i32) -> (i32, i32) {
    %c0_i32 = arith.constant 0 : i32
    %c0_i32_0 = arith.constant 0 : i32
    %c0_i32_1 = arith.constant 0 : i32
    return %c0_i32, %c0_i32_0 : i32, i32
  }
  func.func @transform_8(%arg0: i32) -> (i32, i32, i32) {
    %c0_i32 = arith.constant 0 : i32
    %c0_i32_0 = arith.constant 0 : i32
    %c0_i32_1 = arith.constant 0 : i32
    %c0_i32_2 = arith.constant 0 : i32
    return %c0_i32, %c0_i32_0, %c0_i32_1 : i32, i32, i32
  }
  func.func @transform_9(%arg0: i32) -> (i32, i32) {
    %c0_i32 = arith.constant 0 : i32
    %c0_i32_0 = arith.constant 0 : i32
    %c0_i32_1 = arith.constant 0 : i32
    return %c0_i32, %c0_i32_0 : i32, i32
  }
  func.func @transform_10(%arg0: i32) -> (i32, i32) {
    %c0_i32 = arith.constant 0 : i32
    %c0_i32_0 = arith.constant 0 : i32
    %c0_i32_1 = arith.constant 0 : i32
    return %c0_i32, %c0_i32_0 : i32, i32
  }
  func.func @transform_11(%arg0: i32) -> (i32, i32) {
    %c0_i32 = arith.constant 0 : i32
    %c0_i32_0 = arith.constant 0 : i32
    %c0_i32_1 = arith.constant 0 : i32
    return %c0_i32, %c0_i32_0 : i32, i32
  }
  func.func @transform_12(%arg0: i32) -> (i32, i32) {
    %c0_i32 = arith.constant 0 : i32
    %c0_i32_0 = arith.constant 0 : i32
    %c0_i32_1 = arith.constant 0 : i32
    return %c0_i32, %c0_i32_0 : i32, i32
  }
  func.func @transform_13(%arg0: i32) -> (i32, i32, i32) {
    %c0_i32 = arith.constant 0 : i32
    %c0_i32_0 = arith.constant 0 : i32
    %c0_i32_1 = arith.constant 0 : i32
    %c0_i32_2 = arith.constant 0 : i32
    return %c0_i32, %c0_i32_0, %c0_i32_1 : i32, i32, i32
  }
  func.func @transform_14(%arg0: i32) -> (i32, i32) {
    %c0_i32 = arith.constant 0 : i32
    %c0_i32_0 = arith.constant 0 : i32
    %c0_i32_1 = arith.constant 0 : i32
    return %c0_i32, %c0_i32_0 : i32, i32
  }
  func.func @transform_15(%arg0: i32) -> (i32, i32) {
    %c0_i32 = arith.constant 0 : i32
    %c0_i32_0 = arith.constant 0 : i32
    %c0_i32_1 = arith.constant 0 : i32
    return %c0_i32, %c0_i32_0 : i32, i32
  }
  func.func @transform_16(%arg0: i32) -> (i32, i32) {
    %c0_i32 = arith.constant 0 : i32
    %c0_i32_0 = arith.constant 0 : i32
    %c0_i32_1 = arith.constant 0 : i32
    return %c0_i32, %c0_i32_0 : i32, i32
  }
  func.func @transform_17(%arg0: i32) -> (i32, i32) {
    %c0_i32 = arith.constant 0 : i32
    %c0_i32_0 = arith.constant 0 : i32
    %c0_i32_1 = arith.constant 0 : i32
    return %c0_i32, %c0_i32_0 : i32, i32
  }
  func.func @transform_18(%arg0: i32) -> (i32, i32) {
    %c0_i32 = arith.constant 0 : i32
    %c0_i32_0 = arith.constant 0 : i32
    %c0_i32_1 = arith.constant 0 : i32
    return %c0_i32, %c0_i32_0 : i32, i32
  }
  func.func @transform_19(%arg0: i32) -> (i32, i32, i32) {
    %c0_i32 = arith.constant 0 : i32
    %c0_i32_0 = arith.constant 0 : i32
    %c0_i32_1 = arith.constant 0 : i32
    %c0_i32_2 = arith.constant 0 : i32
    return %c0_i32, %c0_i32_0, %c0_i32_1 : i32, i32, i32
  }
  func.func @transform_20(%arg0: i32) -> (i32, i32) {
    %c0_i32 = arith.constant 0 : i32
    %c0_i32_0 = arith.constant 0 : i32
    %c0_i32_1 = arith.constant 0 : i32
    return %c0_i32, %c0_i32_0 : i32, i32
  }
  func.func @transform_21(%arg0: i32) -> (i32, i32) {
    %c0_i32 = arith.constant 0 : i32
    %c0_i32_0 = arith.constant 0 : i32
    %c0_i32_1 = arith.constant 0 : i32
    return %c0_i32, %c0_i32_0 : i32, i32
  }
  func.func @transform_22(%arg0: i32) -> (i32, i32, i32) {
    %c0_i32 = arith.constant 0 : i32
    %c0_i32_0 = arith.constant 0 : i32
    %c0_i32_1 = arith.constant 0 : i32
    return %arg0, %c0_i32, %c0_i32_0 : i32, i32, i32
  }
}

</mosaic_0001>

<bundles_post_ra>
// kernel: tpu_custom_call.1
= control target key start
LH: loop header
LB: loop body
LE: loop exit
PB: predicated region body
PF: predicated region fallthrough
CT: control target
= control target key end

     0   :  { %s5011_s0 = inlined_call_operand.hbm [shape: f32[2,16,128], index: 0, kind: input, shape index: {}]   ;;  %s5012_s1 = inlined_call_operand.vmem [shape: f32[128,32], index: 1, kind: input, shape index: {}]   ;;  %s5013_s2 = inlined_call_operand.vmem [shape: f32[1,32], index: 2, kind: input, shape index: {}]   ;;  %s5014_s3 = inlined_call_operand.vmem [shape: f32[3,32,64], index: 3, kind: input, shape index: {}]   ;;  %s5015_s4 = inlined_call_operand.vmem [shape: f32[1,64], index: 4, kind: input, shape index: {}]   ;;  %s5016_s5 = inlined_call_operand.hbm [shape: f32[32,64], index: 5, kind: input, shape index: {}]   ;;  %s5017_s6 = inlined_call_operand.vmem [shape: f32[128,32], index: 6, kind: input, shape index: {}]   ;;  %s5018_s7 = inlined_call_operand.vmem [shape: f32[1,32], index: 7, kind: input, shape index: {}]   ;;  %s5019_s8 = inlined_call_operand.vmem [shape: f32[3,32,64], index: 8, kind: input, shape index: {}]   ;;  %s5020_s9 = inlined_call_operand.vmem [shape: f32[1,64], index: 9, kind: input, shape index: {}]   ;;  %s5021_s10 = inlined_call_operand.hbm [shape: f32[32,64], index: 10, kind: input, shape index: {}]   ;;  %s5022_s11 = inlined_call_operand.vmem [shape: f32[64,32], index: 11, kind: input, shape index: {}]   ;;  %s5023_s12 = inlined_call_operand.vmem [shape: f32[1,32], index: 12, kind: input, shape index: {}]   ;;  %s5024_s13 = inlined_call_operand.hbm [shape: f32[3,32,64], index: 13, kind: input, shape index: {}]   ;;  %s5025_s14 = inlined_call_operand.vmem [shape: f32[1,64], index: 14, kind: input, shape index: {}]   ;;  %s5026_s15 = inlined_call_operand.hbm [shape: f32[32,64], index: 15, kind: input, shape index: {}]   ;;  %s5027_s16 = inlined_call_operand.vmem [shape: f32[64,64], index: 16, kind: input, shape index: {}]   ;;  %s5028_s17 = inlined_call_operand.hbm [shape: f32[64,64], index: 17, kind: input, shape index: {}]   ;;  %s5029_s18 = inlined_call_operand.vmem [shape: f32[1,64], index: 18, kind: input, shape index: {}]   ;;  %s5030_s19 = inlined_call_operand.vmem [shape: f32[3,64,128], index: 19, kind: input, shape index: {}]   ;;  %s5031_s20 = inlined_call_operand.vmem [shape: f32[1,128], index: 20, kind: input, shape index: {}]   ;;  %s5032_s21 = inlined_call_operand.hbm [shape: f32[64,128], index: 21, kind: input, shape index: {}]   ;;  %s5033_s22 = inlined_call_operand.hbm [shape: f32[2,16,128], index: 22, kind: output, shape index: {}]  }
   0x1   :  { %5051 = sst [smem:[#allocation22_spill]] %s5011_s0 }
   0x2   :  { %5052 = sst [smem:[#allocation23_spill]] %s5012_s1 }
   0x3   :  { %5053 = sst [smem:[#allocation24_spill]] %s5013_s2 }
   0x4   :  { %5054 = sst [smem:[#allocation25_spill]] %s5014_s3 }
   0x5   :  { %5055 = sst [smem:[#allocation26_spill]] %s5015_s4 }
   0x6   :  { %5056 = sst [smem:[#allocation27_spill]] %s5016_s5 }
   0x7   :  { %5057 = sst [smem:[#allocation28_spill]] %s5017_s6 }
   0x8   :  { %5058 = sst [smem:[#allocation29_spill]] %s5018_s7 }
   0x9   :  { %5059 = sst [smem:[#allocation30_spill]] %s5019_s8 }
   0xa   :  { %5060 = sst [smem:[#allocation31_spill]] %s5020_s9 }
   0xb   :  { %5061 = sst [smem:[#allocation32_spill]] %s5023_s12 }
   0xc   :  { %5062 = sst [smem:[#allocation33_spill]] %s5025_s14 }
   0xd   :  { %5063 = sst [smem:[#allocation34_spill]] %s5027_s16 }
   0xe   :  { %5064 = sst [smem:[#allocation35_spill]] %s5029_s18 }
   0xf   :  { %5065 = sst [smem:[#allocation36_spill]] %s5030_s19 }
  0x10   :  { %5066 = sst [smem:[#allocation37_spill]] %s5031_s20 }
  0x11   :  { %5067 = sst [smem:[#allocation38_spill]] %s5033_s22 }
  0x12   :  { %27 = vsyncpa [#allocation5], 0 }
  0x13   :  { %29 = vsyncpa [#allocation5 + $0x1], 0 }
  0x14   :  { %30 = vsyncpa [#allocation8], 0 }
  0x15   :  { %31 = vsyncpa [#allocation11], 0 }
  0x16   :  { %32 = vsyncpa [#allocation14], 0 }
  0x17   :  { %33 = vsyncpa [#allocation6], 0 }
  0x18   :  { %35 = vsyncpa [#allocation6 + $0x1], 0  ;;  %s4281_s3 = smov 0   ;;  %s4283_s28 = smov 0  }
  0x19   :  { %s4285_s29 = smov 0   ;;  %s4287_s30 = smov 0  }
  0x1a LB: > { %s4153_s4 = smov [#allocation7]   ;;  %s4302_s23 = sadd.s32 4294967295, %s4151_s30   ;;  %s4151_s30 = sphi %s4287_s30, %s5110_s30   ;;  %s4147_s29 = sphi %s4285_s29, %s5109_s29   ;;  %s4143_s28 = sphi %s4283_s28, %s5108_s28   ;;  %s4139_s3 = sphi %s4281_s3, %s5107_s3  }
  0x1b   : > { %s563_s0 = sshll.u32 %s4153_s4, 4  ;;  %p2885_p0 = scmp.ge.s32.totalorder %s4151_s30, 1  ;;  %s4307_s0 = int_to_ptr.vmem [resolvable:$true] %s563_s0 }
  0x1c   : > { %p5043_p1 = scmp.eq.s32.totalorder %s4302_s23, 0  ;;  %p539_p2 = scmp.lt.s32.totalorder %s4151_s30, 3 }
  0x1d   : > { %s4154_s5 = smov [#allocation10]   ;;  %s4155_s25 = smov [#allocation13]  }
  0x1e   : > { %p4309_p3 = pnand %p2885_p0, %p539_p2  ;;  %s607_s24 = sshll.u32 %s4154_s5, 4  ;;  %s4322_s24 = int_to_ptr.vmem [resolvable:$true] %s607_s24 }
  0x1f   : > { %s639_s26 = sshll.u32 %s4155_s25, 4  ;;  %s5070_s4 = sld [smem:[#allocation27_spill]]  ;;  %s4324_s26 = int_to_ptr.vmem [resolvable:$true] %s639_s26 }
  0x20   : > { %s5068_s1 = scalar_select %p4309_p3, 1, 0 }
  0x21   : > { %p3791_p5 = pneg %p4309_p3 }
  0x23   : > { %p4318_p6 = pnand %p3791_p5, %p5043_p1 }
  0x25   : > { %s3875_s22 = scalar_lea.hbm %s5070_s4, 512  ;;  %p4334_p8 = pneg %p4318_p6 }
  0x26   : > { %p3876_p7 = scmp.ne.s32.totalorder %s5070_s4, %s3875_s22  ;;  %p3882_p11 = scmp.lt.u32.totalorder %s3875_s22, %s5070_s4 }
  0x28   : > { %p3878_p9 = pnand %p4334_p8, %p3876_p7 }
  0x2a   : > { %p3879_p10 = pneg %p3878_p9 }
  0x2c   : > { %p3884_p12 = pnand %p3882_p11, %p3879_p10 }
  0x2e   : > { %3887 = shalt.err (!%p3884_p12)
}
  0x2f   : > { %s3888_s18 = scalar_lea.vmem %s4307_s0, 512  ;;  %p3896_p5 = scmp.lt.s32.totalorder %s4307_s0, %s4307_s0 }
  0x30   : > { %p3889_p13 = scmp.ne.s32.totalorder %s4307_s0, %s3888_s18  ;;  %p3897_p4 = scmp.lt.s32.totalorder %s3888_s18, %s3888_s18 }
  0x32   : > { %p3891_p0 = pnand %p3889_p13, %p4334_p8  ;;  %p3898_p7 = por %p3897_p4, %p3896_p5 }
  0x34   : > { %p3892_p2 = pneg %p3891_p0 }
  0x36   : > { %p3899_p9 = pnand %p3898_p7, %p3892_p2 }
  0x38   : > { %3902 = shalt.err (!%p3899_p9)
}
  0x39   : > { %s5045_s20 = smov 128   ;;  %s5046_s19 = smov 8  }
  0x3a   : > { %3794 = dma.hbm_to_vmem [thread:$0]  (!%p4318_p6), %s5070_s4, 512, %s4307_s0, [#allocation8], %s5045_s20, %s5045_s20, %s5046_s19  }
  0x3b   : > { %s3903_s18 = scalar_lea.hbm %s5024_s13, 1536 }
  0x3c   : > { %p3904_p4 = scmp.ne.s32.totalorder %s5024_s13, %s3903_s18  ;;  %p3910_p12 = scmp.lt.u32.totalorder %s3903_s18, %s5024_s13 }
  0x3e   : > { %p3906_p10 = pnand %p3904_p4, %p4334_p8 }
  0x40   : > { %p3907_p11 = pneg %p3906_p10 }
  0x42   : > { %p3912_p13 = pnand %p3910_p12, %p3907_p11 }
  0x44   : > { %3915 = shalt.err (!%p3912_p13)
}
  0x45   : > { %s3916_s0 = scalar_lea.vmem %s4322_s24, 1536  ;;  %p3924_p7 = scmp.lt.s32.totalorder %s4322_s24, %s4322_s24 }
  0x46   : > { %p3917_p0 = scmp.ne.s32.totalorder %s4322_s24, %s3916_s0  ;;  %p3925_p9 = scmp.lt.s32.totalorder %s3916_s0, %s3916_s0 }
  0x48   : > { %p3919_p2 = pnand %p3917_p0, %p4334_p8  ;;  %p3926_p4 = por %p3925_p9, %p3924_p7 }
  0x4a   : > { %p3920_p5 = pneg %p3919_p2 }
  0x4c   : > { %p3927_p10 = pnand %p3926_p4, %p3920_p5 }
  0x4e   : > { %3930 = shalt.err (!%p3927_p10)
}
  0x4f   : > { %3800 = dma.hbm_to_vmem [thread:$0]  (!%p4318_p6), %s5024_s13, 1536, %s4322_s24, [#allocation11], %s5045_s20, %s5045_s20, %s5046_s19  }
  0x50   : > { %s3931_s22 = scalar_lea.hbm %s5028_s17, 1024 }
  0x51   : > { %p3932_p11 = scmp.ne.s32.totalorder %s5028_s17, %s3931_s22  ;;  %p3938_p0 = scmp.lt.u32.totalorder %s3931_s22, %s5028_s17 }
  0x53   : > { %p3934_p12 = pnand %p3932_p11, %p4334_p8 }
  0x55   : > { %p3935_p13 = pneg %p3934_p12 }
  0x57   : > { %p3940_p2 = pnand %p3938_p0, %p3935_p13 }
  0x59   : > { %3943 = shalt.err (!%p3940_p2)
}
  0x5a   : > { %s3944_s24 = scalar_lea.vmem %s4324_s26, 1024  ;;  %p3952_p4 = scmp.lt.s32.totalorder %s4324_s26, %s4324_s26 }
  0x5b   : > { %p3945_p5 = scmp.ne.s32.totalorder %s4324_s26, %s3944_s24  ;;  %p3953_p10 = scmp.lt.s32.totalorder %s3944_s24, %s3944_s24 }
  0x5d   : > { %p3947_p7 = pnand %p3945_p5, %p4334_p8  ;;  %p3954_p11 = por %p3953_p10, %p3952_p4 }
  0x5f   : > { %p3948_p9 = pneg %p3947_p7 }
  0x61   : > { %p3955_p12 = pnand %p3954_p11, %p3948_p9 }
  0x63   : > { %3958 = shalt.err (!%p3955_p12)
}
  0x64   : > { %3806 = dma.hbm_to_vmem [thread:$0]  (!%p4318_p6), %s5028_s17, 1024, %s4324_s26, [#allocation14], %s5045_s20, %s5045_s20, %s5046_s19  }
  0x65   : > { %s4158_s12 = smov [#allocation9]   ;;  %s4159_s16 = smov [#allocation12]  }
  0x66   : > { %s588_s14 = sshll.u32 %s4158_s12, 4  ;;  %s623_s22 = sshll.u32 %s4159_s16, 4  ;;  %s589_s14 = int_to_ptr.vmem [resolvable:$true] %s588_s14  ;;  %s624_s22 = int_to_ptr.vmem [resolvable:$true] %s623_s22 }
  0x67   : > { %s3959_s25 = scalar_lea.hbm %s5021_s10, 512 }
  0x68   : > { %p3960_p13 = scmp.ne.s32.totalorder %s5021_s10, %s3959_s25  ;;  %p3966_p5 = scmp.lt.u32.totalorder %s3959_s25, %s5021_s10 }
  0x6a   : > { %p3962_p0 = pnand %p3960_p13, %p4334_p8 }
  0x6c   : > { %p3963_p2 = pneg %p3962_p0 }
  0x6e   : > { %p3968_p7 = pnand %p3966_p5, %p3963_p2 }
  0x70   : > { %3971 = shalt.err (!%p3968_p7)
}
  0x71   : > { %s3972_s26 = scalar_lea.vmem %s589_s14, 512  ;;  %p3980_p11 = scmp.lt.s32.totalorder %s589_s14, %s589_s14 }
  0x72   : > { %p3973_p9 = scmp.ne.s32.totalorder %s589_s14, %s3972_s26  ;;  %p3981_p12 = scmp.lt.s32.totalorder %s3972_s26, %s3972_s26 }
  0x74   : > { %p3975_p4 = pnand %p3973_p9, %p4334_p8  ;;  %p3982_p1 = por %p3981_p12, %p3980_p11 }
  0x76   : > { %p3976_p10 = pneg %p3975_p4 }
  0x78   : > { %p3983_p3 = pnand %p3982_p1, %p3976_p10 }
  0x7a   : > { %3986 = shalt.err (!%p3983_p3)
}
  0x7b   : > { %3797 = dma.hbm_to_vmem [thread:$0]  (!%p4318_p6), %s5021_s10, 512, %s589_s14, [#allocation8], %s5045_s20, %s5045_s20, %s5046_s19  }
  0x7c   : > { %s3987_s2 = scalar_lea.hbm %s5026_s15, 512 }
  0x7d   : > { %p3988_p1 = scmp.ne.s32.totalorder %s5026_s15, %s3987_s2  ;;  %p3994_p0 = scmp.lt.u32.totalorder %s3987_s2, %s5026_s15 }
  0x7f   : > { %p3990_p3 = pnand %p3988_p1, %p4334_p8 }
  0x81   : > { %p3991_p13 = pneg %p3990_p3 }
  0x83   : > { %p3996_p2 = pnand %p3994_p0, %p3991_p13 }
  0x85   : > { %3999 = shalt.err (!%p3996_p2)
}
  0x86   : > { %s4000_s0 = scalar_lea.vmem %s624_s22, 512  ;;  %p4008_p4 = scmp.lt.s32.totalorder %s624_s22, %s624_s22 }
  0x87   : > { %p4001_p5 = scmp.ne.s32.totalorder %s624_s22, %s4000_s0  ;;  %p4009_p10 = scmp.lt.s32.totalorder %s4000_s0, %s4000_s0 }
  0x89   : > { %p4003_p7 = pnand %p4001_p5, %p4334_p8  ;;  %p4010_p11 = por %p4009_p10, %p4008_p4 }
  0x8b   : > { %p4004_p9 = pneg %p4003_p7 }
  0x8d   : > { %p4011_p12 = pnand %p4010_p11, %p4004_p9 }
  0x8f   : > { %4014 = shalt.err (!%p4011_p12)
}
  0x90   : > { %3803 = dma.hbm_to_vmem [thread:$0]  (!%p4318_p6), %s5026_s15, 512, %s624_s22, [#allocation11], %s5045_s20, %s5045_s20, %s5046_s19  }
  0x91   : > { %s4160_s4 = smov [#allocation15]   ;;  %s4015_s2 = scalar_lea.hbm %s5032_s21, 1024 }
  0x92   : > { %s661_s9 = sshll.u32 %s4160_s4, 4  ;;  %p4016_p1 = scmp.ne.s32.totalorder %s5032_s21, %s4015_s2  ;;  %s662_s9 = int_to_ptr.vmem [resolvable:$true] %s661_s9 }
  0x93   : > { %p4022_p0 = scmp.lt.u32.totalorder %s4015_s2, %s5032_s21 }
  0x94   : > { %p4018_p3 = pnand %p4016_p1, %p4334_p8 }
  0x96   : > { %p4019_p13 = pneg %p4018_p3 }
  0x98   : > { %p4024_p2 = pnand %p4022_p0, %p4019_p13 }
  0x9a   : > { %4027 = shalt.err (!%p4024_p2)
}
  0x9b   : > { %s4028_s22 = scalar_lea.vmem %s662_s9, 1024  ;;  %p4036_p4 = scmp.lt.s32.totalorder %s662_s9, %s662_s9 }
  0x9c   : > { %p4029_p5 = scmp.ne.s32.totalorder %s662_s9, %s4028_s22  ;;  %p4037_p10 = scmp.lt.s32.totalorder %s4028_s22, %s4028_s22 }
  0x9e   : > { %p4031_p7 = pnand %p4029_p5, %p4334_p8  ;;  %p4038_p11 = por %p4037_p10, %p4036_p4 }
  0xa0   : > { %p4032_p9 = pneg %p4031_p7 }
  0xa2   : > { %p4039_p12 = pnand %p4038_p11, %p4032_p9 }
  0xa4   : > { %4042 = shalt.err (!%p4039_p12)
}
  0xa5   : > { %3809 = dma.hbm_to_vmem [thread:$0]  (!%p4318_p6), %s5032_s21, 1024, %s662_s9, [#allocation14], %s5045_s20, %s5045_s20, %s5046_s19  }
  0xa6   : > { %s2884_s6 = sadd.s32 4294967294, %s4151_s30   ;;  %s4475_s5 = sadd.s32 1, %s4151_s30  }
  0xa7   : > { %s45_s26 = ssub.s32 %s4151_s30, %s4475_s5  ;;  %s48_s4 = sadd.s32 1, %s4147_s29 }
  0xa8   : > { %p46_p8 = scmp.eq.s32.totalorder %s45_s26, 0  ;;  %p55_p1 = scmp.ne.s32.totalorder %s4147_s29, %s4143_s28 }
  0xa9   : > { %p56_p3 = scmp.eq.s32.totalorder %s4151_s30, 0  ;;  %p61_p13 = scmp.ne.s32.totalorder %s4143_s28, %s4139_s3 }
  0xaa   : > { %s4486_s12 = scalar_select %p46_p8, %s4147_s29, %s48_s4  }
  0xab   : > { %p4488_p0 = por %p56_p3, %p55_p1  ;;  %p5073_p2 = scmp.eq.s32.totalorder %s4302_s23, 0 }
  0xac   : > { %p526_p5 = scmp.eq.s32.totalorder %s4302_s23, 1  ;;  %p532_p7 = scmp.eq.s32.totalorder %s2884_s6, 1 }
  0xad   : > { %p4494_p6 = por %p5073_p2, %p61_p13  ;;  %p3824_p9 = scmp.lt.s32.totalorder %s4151_s30, 2 }
  0xae   : > { %s675_s2 = sand.u32 1, %s4147_s29   ;;  %p4501_p4 = por %p526_p5, %p55_p1 }
  0xaf   : > { %p4505_p10 = por %p532_p7, %p61_p13  ;;  %s2893_s18 = sshll.u32 %s675_s2, 4 }
  0xb0   : > { %s5075_s27 = scalar_select %p4501_p4, 1, 0 }
  0xb1   : > { %s5076_s25 = scalar_select %p4505_p10, 1, 0 }
  0xb2   : > { %s2956_s24 = sshll.u32 %s4151_s30, 8  ;;  %s5077_s14 = sld [smem:[#allocation22_spill]] }
  0xb3   : > { %s679_s6 = scalar_lea.vmem [#allocation4], %s2893_s18  ;;  %p4519_p11 = pnand %p3824_p9, %p4488_p0 }
  0xb4   : > { %s686_s4 = sshll.u32 %s679_s6, 4  ;;  %s4523_s19 = scalar_lea.sflag [#allocation5], %s675_s2  ;;  %s4515_s4 = int_to_ptr.vmem [resolvable:$true] %s686_s4 }
  0xb5   : > { %p4045_p8 = pneg %p4519_p11 }
  0xb8   : > { %s4513_s26 = scalar_lea.hbm %s5077_s14, %s2956_s24  ;;  %s4048_s16 = scalar_lea.hbm %s5077_s14, 512 }
  0xb9   : > { %s4043_s22 = scalar_lea.hbm %s4513_s26, 256  ;;  %p4049_p13 = scmp.lt.u32.totalorder %s4513_s26, %s5077_s14 }
  0xba   : > { %p4044_p12 = scmp.ne.s32.totalorder %s4513_s26, %s4043_s22  ;;  %p4050_p0 = scmp.lt.u32.totalorder %s4048_s16, %s4043_s22 }
  0xbb   : > { %p4052_p5 = scmp.lt.u32.totalorder %s4043_s22, %s4513_s26 }
  0xbc   : > { %p4046_p1 = pnand %p4045_p8, %p4044_p12  ;;  %p4051_p2 = por %p4050_p0, %p4049_p13 }
  0xbe   : > { %p4047_p3 = pneg %p4046_p1  ;;  %p4053_p7 = por %p4052_p5, %p4051_p2 }
  0xc0   : > { %p4054_p9 = pnand %p4053_p7, %p4047_p3 }
  0xc2   : > { %4057 = shalt.err (!%p4054_p9)
}
  0xc3   : > { %s4058_s2 = scalar_lea.vmem %s4515_s4, 256  ;;  %s4161_s18 = smov [#allocation4]  }
  0xc4   : > { %p4059_p12 = scmp.ne.s32.totalorder %s4515_s4, %s4058_s2  ;;  %s4063_s24 = sshll.u32 %s4161_s18, 4  ;;  %s4064_s24 = int_to_ptr.vmem [resolvable:$false] %s4063_s24 }
  0xc5   : > { %s4065_s0 = scalar_lea.vmem %s4064_s24, 512  ;;  %p4066_p4 = scmp.lt.s32.totalorder %s4515_s4, %s4064_s24 }
  0xc6   : > { %p4061_p1 = pnand %p4059_p12, %p4045_p8  ;;  %p4067_p13 = scmp.lt.s32.totalorder %s4065_s0, %s4058_s2 }
  0xc8   : > { %p4062_p10 = pneg %p4061_p1  ;;  %p4068_p0 = por %p4067_p13, %p4066_p4 }
  0xca   : > { %p4069_p2 = pnand %p4068_p0, %p4062_p10 }
  0xcc   : > { %4072 = shalt.err (!%p4069_p2)
}
  0xcd   : > { %s5079_s22 = smov 8   ;;  %s5080_s16 = smov 128  }
  0xce   : > { %3813 = dma.hbm_to_vmem [thread:$0]  (!%p4519_p11), %s4513_s26, 256, %s4515_s4, %s4523_s19, %s5080_s16, %s5080_s16, %s5079_s22  }
  0xcf   : > { %p5081_p8 = scmp.ne.s32.totalorder %s5068_s1, 0 }
  0xd0   : > { %s4557_s6 = sand.u32 (!%p5081_p8), 1, %s4143_s28  }
  0xd1   : > { %698 = sbr.rel (%p5081_p8) target bundleno = 1714 (0x6b2), region = 108  ;;  %s5048_s2 = sshll.u32 (!%p5081_p8), %s4557_s6, 4 }
  0xd2   : > { %s701_s18 = scalar_lea.sflag (!%p5081_p8), [#allocation5], %s4557_s6  ;;  %s4563_s20 = scalar_lea.vmem (!%p5081_p8), [#allocation4], %s5048_s2 }
  0xd8   : > { %4118 = dma.done.wait (%p4494_p6), %s701_s18, 256  }
  0xd9   : > { %4120 = vsyncadd (%p4494_p6), %s701_s18, 4294967040  ;;  %p5082_p4 = scmp.eq.s32.totalorder %s4302_s23, 0 }
  0xdb   : > { %4122 = dma.done.wait (%p5082_p4), [#allocation8], 1024   ;;  %p5083_p10 = pmov %p5082_p4 }
  0xdc   : > { %p5084_p11 = pmov %p5082_p4 }
  0xdd   : > { %4124 = vsyncadd (%p5083_p10), [#allocation8], 4294966272 }
  0xde   : > { %4126 = dma.done.wait (%p5084_p11), [#allocation11], 2048   ;;  %p5085_p3 = pmov %p5082_p4 }
  0xe0   : > { %4128 = vsyncadd (%p5085_p3), [#allocation11], 4294965248  ;;  %p5086_p5 = pmov %p5085_p3 }
  0xe1   : > { %p5087_p7 = pmov %p5085_p3 }
  0xe2   : > { %4130 = dma.done.wait (%p5086_p5), [#allocation14], 2048  }
  0xe3   : > { %4132 = vsyncadd (%p5087_p7), [#allocation14], 4294965248  ;;  %s5088_s9 = sld [smem:[#allocation23_spill]]  ;;  %v795_v9 = vld [vmem:[%s4563_s20] sm:$0xff]  ;;  %v4631_v25 = vld [vmem:[%s4563_s20 + $0x8] sm:$0xff]  ;;  %s5089_s24 = sld [smem:[#allocation25_spill]] }
  0xe4   : > { %3168 = vmatprep.mubr.f32.mxu0 %v795_v9  ;;  %vm789_vm0 = vcmask 253952   ;;  %v4162_v29 = vmov 0.0   ;;  %s5090_s20 = sld [smem:[#allocation28_spill]]  ;;  %v1717_v60 = vld [vmem:[%s5022_s11] sm:$0xff]  ;;  %v1718_v61 = vld [vmem:[%s5022_s11 + $0x8] sm:$0xff]  ;;  %s5091_s26 = sld [smem:[#allocation24_spill]] }
  0xe5   : > { %790 = vst.msk [vmem:[#allocation2] sm:$0x1] %vm789_vm0, %v4162_v29  ;;  %791 = vst.msk [vmem:[#allocation2 + $0x11] sm:$0x1] %vm789_vm0, %v4162_v29  ;;  %v3599_v62 = vpack.c.bf16 %v1718_v61, %v1717_v60  ;;  %vm901_vm1 = vcmask 261120   ;;  %s5092_s8 = sld [smem:[#allocation30_spill]] }
  0xe6   : > { %s5093_s7 = sld [smem:[#allocation29_spill]]  ;;  %s5094_s2 = sld [smem:[#allocation26_spill]]  ;;  %vm1725_vm2 = vcmask 523264   ;;  %vm792_vm3 = vcmask 516096  }
  0xe7   : > { %s5095_s16 = sld [smem:[#allocation31_spill]]  ;;  %s5096_s19 = sld [smem:[#allocation32_spill]]  ;;  %793 = vst.msk [vmem:[#allocation3] sm:$0x1] %vm792_vm3, %v4162_v29  ;;  %794 = vst.msk [vmem:[#allocation3 + $0x11] sm:$0x1] %vm792_vm3, %v4162_v29 }
  0xe8   : > { %s5097_s0 = sld [smem:[#allocation34_spill]]  ;;  %s5100_s1 = sld [smem:[#allocation35_spill]] }
  0xe9   : > { %v798_v0 = vld [vmem:[%s5088_s9] sm:$0xff]  ;;  %v799_v1 = vld [vmem:[%s5088_s9 + $0x8] sm:$0xff]  ;;  %v800_v2 = vld [vmem:[%s5088_s9 + $0x10] sm:$0xff]  ;;  %s5101_s4 = sld [smem:[#allocation37_spill]]  ;;  %s2957_s18 = sshll.u32 %s4302_s23, 8 }
  0xea   : > { %v3471_v3 = vpack.c.bf16 %v799_v1, %v798_v0  ;;  %v801_v4 = vld [vmem:[%s5088_s9 + $0x18] sm:$0xff]  ;;  %v802_v6 = vld [vmem:[%s5088_s9 + $0x20] sm:$0xff]  ;;  %v803_v7 = vld [vmem:[%s5088_s9 + $0x28] sm:$0xff]  ;;  %p5104_p9 = scmp.ne.s32.totalorder %s5075_s27, 0  ;;  %s4163_s23 = smov [#allocation16]  }
  0xeb   : > { %v3475_v5 = vpack.c.bf16 %v801_v4, %v800_v2  ;;  %v3479_v8 = vpack.c.bf16 %v803_v7, %v802_v6  ;;  %v804_v10 = vld [vmem:[%s5088_s9 + $0x30] sm:$0xff]  ;;  %v805_v11 = vld [vmem:[%s5088_s9 + $0x38] sm:$0xff]  ;;  %v806_v13 = vld [vmem:[%s5088_s9 + $0x40] sm:$0xff] }
  0xec   : > { %3472 = vmatprep.subr.bf16.mxu0 %v3471_v3  ;;  %v3483_v12 = vpack.c.bf16 %v805_v11, %v804_v10  ;;  %v807_v14 = vld [vmem:[%s5088_s9 + $0x48] sm:$0xff]  ;;  %v808_v16 = vld [vmem:[%s5088_s9 + $0x50] sm:$0xff]  ;;  %v809_v17 = vld [vmem:[%s5088_s9 + $0x58] sm:$0xff] }
  0xed   : > { %3474 = vmatpush3.bf16.msra.mxu0 %v3471_v3  ;;  %v3487_v15 = vpack.c.bf16 %v807_v14, %v806_v13  ;;  %v3491_v18 = vpack.c.bf16 %v809_v17, %v808_v16  ;;  %v810_v19 = vld [vmem:[%s5088_s9 + $0x60] sm:$0xff]  ;;  %v811_v20 = vld [vmem:[%s5088_s9 + $0x68] sm:$0xff]  ;;  %v812_v22 = vld [vmem:[%s5088_s9 + $0x70] sm:$0xff] }
  0xee   : > { %3476 = vmatprep.subr.bf16.mxu0 %v3475_v5  ;;  %v3495_v21 = vpack.c.bf16 %v811_v20, %v810_v19  ;;  %v813_v23 = vld [vmem:[%s5088_s9 + $0x78] sm:$0xff]  ;;  %v904_v26 = vld [vmem:[%s5089_s24] sm:$0xff]  ;;  %v905_v27 = vld [vmem:[%s5089_s24 + $0x8] sm:$0xff]  ;;  %s5099_s9 = sld [smem:[#allocation36_spill]] }
  0xef   : > { %v3499_v24 = vpack.c.bf16 %v813_v23, %v812_v22  ;;  %v3503_v28 = vpack.c.bf16 %v905_v27, %v904_v26  ;;  %v906_v30 = vld [vmem:[%s5089_s24 + $0x10] sm:$0xff]  ;;  %v907_v31 = vld [vmem:[%s5089_s24 + $0x18] sm:$0xff]  ;;  %v908_v33 = vld [vmem:[%s5089_s24 + $0x20] sm:$0xff] }
  0xf0   : > { %v3507_v32 = vpack.c.bf16 %v907_v31, %v906_v30  ;;  %v909_v34 = vld [vmem:[%s5089_s24 + $0x28] sm:$0xff]  ;;  %v1258_v36 = vld [vmem:[%s5090_s20] sm:$0xff]  ;;  %v1260_v38 = vld [vmem:[%s5090_s20 + $0x10] sm:$0xff] }
  0xf1   : > { %3478 = vmatpush3.bf16.msra.mxu0 %v3475_v5  ;;  %3504 = vmatprep.subr.bf16.mxu1 %v3503_v28  ;;  %v4654_v35 = vpack.c.bf16 %v909_v34, %v908_v33  ;;  %v1259_v37 = vld [vmem:[%s5090_s20 + $0x8] sm:$0xff]  ;;  %v1261_v40 = vld [vmem:[%s5090_s20 + $0x18] sm:$0xff]  ;;  %v1262_v42 = vld [vmem:[%s5090_s20 + $0x20] sm:$0xff] }
  0xf2   : > { %3480 = vmatprep.subr.bf16.mxu0 %v3479_v8  ;;  %3506 = vmatpush3.bf16.msra.mxu1 %v3503_v28  ;;  %v3535_v39 = vpack.c.bf16 %v1259_v37, %v1258_v36  ;;  %v3539_v41 = vpack.c.bf16 %v1261_v40, %v1260_v38  ;;  %v1263_v43 = vld [vmem:[%s5090_s20 + $0x28] sm:$0xff]  ;;  %v1264_v45 = vld [vmem:[%s5090_s20 + $0x30] sm:$0xff]  ;;  %v1265_v46 = vld [vmem:[%s5090_s20 + $0x38] sm:$0xff] }
  0xf3   : > { %3508 = vmatprep.subr.bf16.mxu1 %v3507_v32  ;;  %v3543_v44 = vpack.c.bf16 %v1263_v43, %v1262_v42  ;;  %v3547_v47 = vpack.c.bf16 %v1265_v46, %v1264_v45  ;;  %v1266_v48 = vld [vmem:[%s5090_s20 + $0x40] sm:$0xff]  ;;  %v1267_v49 = vld [vmem:[%s5090_s20 + $0x48] sm:$0xff]  ;;  %v1268_v51 = vld [vmem:[%s5090_s20 + $0x50] sm:$0xff] }
  0xf4   : > { %v3551_v50 = vpack.c.bf16 %v1267_v49, %v1266_v48  ;;  %v1269_v52 = vld [vmem:[%s5090_s20 + $0x58] sm:$0xff]  ;;  %v1270_v54 = vld [vmem:[%s5090_s20 + $0x60] sm:$0xff]  ;;  %v1271_v55 = vld [vmem:[%s5090_s20 + $0x68] sm:$0xff] }
  0xf5   : > { %3482 = vmatpush3.bf16.msra.mxu0 %v3479_v8  ;;  %v3555_v53 = vpack.c.bf16 %v1269_v52, %v1268_v51  ;;  %v3559_v56 = vpack.c.bf16 %v1271_v55, %v1270_v54  ;;  %v1272_v57 = vld [vmem:[%s5090_s20 + $0x70] sm:$0xff]  ;;  %v1273_v58 = vld [vmem:[%s5090_s20 + $0x78] sm:$0xff]  ;;  %v2905_v63 = vld [vmem:[%s5091_s26] ss:$0 sm:$0xff]  ;;  %s5098_s26 = sld [smem:[#allocation33_spill]] }
  0xf6   : > { %3484 = vmatprep.subr.bf16.mxu0 %v3483_v12  ;;  %3510 = vmatpush3.bf16.msra.mxu1 %v3507_v32  ;;  %v3563_v59 = vpack.c.bf16 %v1273_v58, %v1272_v57  ;;  %v910_v8 = vld [vmem:[%s5089_s24 + $0x30] sm:$0xff]  ;;  %v912_v13 = vld [vmem:[%s5089_s24 + $0x40] sm:$0xff]  ;;  %v913_v14 = vld [vmem:[%s5089_s24 + $0x48] sm:$0xff] }
  0xf7   : > { %3512 = vmatprep.subr.bf16.mxu1 %v4654_v35  ;;  %v914_v16 = vld [vmem:[%s5089_s24 + $0x50] sm:$0xff]  ;;  %v915_v17 = vld [vmem:[%s5089_s24 + $0x58] sm:$0xff]  ;;  %v1180_v23 = vld [vmem:[#allocation7 + $0x10] sm:$0xff] }
  0xf8   : > { %v1178_v19 = vld [vmem:[#allocation7] sm:$0xff]  ;;  %v1179_v20 = vld [vmem:[#allocation7 + $0x8] sm:$0xff]  ;;  %v1721_v31 = vld [vmem:[%s5022_s11 + $0x20] sm:$0xff] }
  0xf9   : > { %3486 = vmatpush3.bf16.msra.mxu0 %v3483_v12  ;;  %v3527_v22 = vpack.c.bf16 %v1179_v20, %v1178_v19  ;;  %v1719_v27 = vld [vmem:[%s5022_s11 + $0x10] sm:$0xff]  ;;  %v1720_v28 = vld [vmem:[%s5022_s11 + $0x18] sm:$0xff]  ;;  %v1722_v32 = vld [vmem:[%s5022_s11 + $0x28] sm:$0xff] }
  0xfa   : > { %3488 = vmatprep.subr.bf16.mxu0 %v3487_v15  ;;  %v3603_v30 = vpack.c.bf16 %v1720_v28, %v1719_v27  ;;  %v3607_v33 = vpack.c.bf16 %v1722_v32, %v1721_v31  ;;  %v1723_v34 = vld [vmem:[%s5022_s11 + $0x30] sm:$0xff]  ;;  %v1363_v37 = vld [vmem:[%s5092_s8] sm:$0xff]  ;;  %v1364_v38 = vld [vmem:[%s5092_s8 + $0x8] sm:$0xff] }
  0xfb   : > { %v1365_v40 = vld [vmem:[%s5092_s8 + $0x10] sm:$0xff]  ;;  %v1367_v43 = vld [vmem:[%s5092_s8 + $0x20] sm:$0xff]  ;;  %v1372_v61 = vld [vmem:[%s5092_s8 + $0x48] sm:$0xff] }
  0xfc   : > { %v2915_v46 = vld [vmem:[%s5093_s7] ss:$0 sm:$0xff]  ;;  %v1369_v55 = vld [vmem:[%s5092_s8 + $0x30] sm:$0xff]  ;;  %v2098_v27 = vld [vmem:[#allocation12 + $0x18] sm:$0xff]  ;;  %s4077_s7 = sshll.u32 %s4163_s23, 4  ;;  %s4078_s7 = int_to_ptr.vmem [resolvable:$false] %s4077_s7 }
  0xfd   : > { %3490 = vmatpush3.bf16.msra.mxu0 %v3487_v15  ;;  %v3519_v15 = vpack.c.bf16 %v913_v14, %v912_v13  ;;  %v1371_v60 = vld [vmem:[%s5092_s8 + $0x40] sm:$0xff]  ;;  %v1822_v31 = vld [vmem:[#allocation10 + $0x8] sm:$0xff]  ;;  %v2378_v29 = vld [vmem:[%s5099_s9 + $0x48] sm:$0xff] }
  0xfe   : > { %3492 = vmatprep.subr.bf16.mxu0 %v3491_v18 }
 0x101   : > { %3494 = vmatpush3.bf16.msra.mxu0 %v3491_v18  ;;  %v3523_v18 = vpack.c.bf16 %v915_v17, %v914_v16 }
 0x102   : > { %3496 = vmatprep.subr.bf16.mxu0 %v3495_v21 }
 0x105   : > { %3498 = vmatpush3.bf16.msra.mxu0 %v3495_v21 }
 0x106   : > { %3500 = vmatprep.subr.bf16.mxu0 %v3499_v24 }
 0x109   : > { %3502 = vmatpush3.bf16.msra.mxu0 %v3499_v24  ;;  %v1181_v24 = vld [vmem:[#allocation7 + $0x18] sm:$0xff] }
 0x10a   : > { %3536 = vmatprep.subr.bf16.mxu0 %v3535_v39 }
 0x10c   : > { %3169 = vmatmul.mubr.f32.vlgmr.msra.gmra.mrb[0].mxu0 %v4631_v25 }
 0x10d   : > { %3247 = vmatprep.mubr.f32.mxu0 %v795_v9  ;;  %3538 = vmatpush3.bf16.msra.mxu0 %v3535_v39  ;;  %v911_v9 = vld [vmem:[%s5089_s24 + $0x38] sm:$0xff]  ;;  %v3567_v39 = vpack.c.bf16 %v1364_v38, %v1363_v37 }
 0x10e   : > { %3540 = vmatprep.subr.bf16.mxu0 %v3539_v41  ;;  %v3515_v12 = vpack.c.bf16 %v911_v9, %v910_v8  ;;  %v1826_v37 = vld [vmem:[#allocation10 + $0x28] sm:$0xff] }
 0x111   : > { %3542 = vmatpush3.bf16.msra.mxu0 %v3539_v41  ;;  %v1366_v41 = vld [vmem:[%s5092_s8 + $0x18] sm:$0xff] }
 0x112   : > { %3544 = vmatprep.subr.bf16.mxu0 %v3543_v44  ;;  %v3571_v42 = vpack.c.bf16 %v1366_v41, %v1365_v40 }
 0x115   : > { %3546 = vmatpush3.bf16.msra.mxu0 %v3543_v44  ;;  %v1368_v44 = vld [vmem:[%s5092_s8 + $0x28] sm:$0xff] }
 0x116   : > { %3548 = vmatprep.subr.bf16.mxu0 %v3547_v47  ;;  %v3575_v45 = vpack.c.bf16 %v1368_v44, %v1367_v43 }
 0x119   : > { %3550 = vmatpush3.bf16.msra.mxu0 %v3547_v47 }
 0x11a   : > { %3552 = vmatprep.subr.bf16.mxu0 %v3551_v50 }
 0x11d   : > { %3554 = vmatpush3.bf16.msra.mxu0 %v3551_v50 }
 0x11e   : > { %3556 = vmatprep.subr.bf16.mxu0 %v3555_v53 }
 0x121   : > { %3558 = vmatpush3.bf16.msra.mxu0 %v3555_v53 }
 0x122   : > { %3560 = vmatprep.subr.bf16.mxu0 %v3559_v56 }
 0x125   : > { %3562 = vmatpush3.bf16.msra.mxu0 %v3559_v56  ;;  %v1370_v56 = vld [vmem:[%s5092_s8 + $0x38] sm:$0xff] }
 0x126   : > { %3564 = vmatprep.subr.bf16.mxu0 %v3563_v59 }
 0x129   : > { %3566 = vmatpush3.bf16.msra.mxu0 %v3563_v59  ;;  %v3579_v59 = vpack.c.bf16 %v1370_v56, %v1369_v55 }
 0x12a   : > { %3600 = vmatprep.subr.bf16.mxu0 %v3599_v62 }
 0x12c   : > { %3248 = vmatmul.mubr.f32.vlgmr.msra.gmra.mrb[2].mxu0 %v4631_v25  ;;  %v3531_v25 = vpack.c.bf16 %v1181_v24, %v1180_v23  ;;  %v2095_v23 = vld [vmem:[#allocation12] sm:$0xff]  ;;  %v2096_v24 = vld [vmem:[#allocation12 + $0x8] sm:$0xff] }
 0x12d   : > { %3602 = vmatpush3.bf16.msra.mxu0 %v3599_v62  ;;  %v3583_v62 = vpack.c.bf16 %v1372_v61, %v1371_v60  ;;  %v1827_v61 = vld [vmem:[#allocation10 + $0x30] sm:$0xff] }
 0x12e   : > { %3604 = vmatprep.subr.bf16.mxu0 %v3603_v30 }
 0x131   : > { %3606 = vmatpush3.bf16.msra.mxu0 %v3603_v30  ;;  %v1821_v30 = vld [vmem:[#allocation10] sm:$0xff] }
 0x132   : > { %3608 = vmatprep.subr.bf16.mxu0 %v3607_v33  ;;  %v3615_v32 = vpack.c.bf16 %v1822_v31, %v1821_v30 }
 0x135   : > { %3610 = vmatpush3.bf16.msra.mxu0 %v3607_v33  ;;  %v1823_v33 = vld [vmem:[#allocation10 + $0x10] sm:$0xff] }
 0x1df   : > { %v3170_v0 = vpop.f32.mrb[0].mxu0 }
 0x1e0   : > { %v896_v1 = vadd.f32 %v3170_v0, %v2905_v63  ;;  %v880_v2 = vpop.f32.mrb[1].mxu0  ;;  %v1374_v0 = vld [vmem:[%s5092_s8 + $0x58] sm:$0xff] }
 0x1e1   : > { %v895_v3 = vadd.f32 %v2905_v63, %v880_v2  ;;  %v1373_v63 = vld [vmem:[%s5092_s8 + $0x50] sm:$0xff]  ;;  %s4079_s8 = scalar_lea.vmem %s4078_s7, 512 }
 0x1e2   : > { %v898_v4 = vmax.f32 %v896_v1, 0.0  ;;  %v3587_v1 = vpack.c.bf16 %v1374_v0, %v1373_v63 }
 0x1e3   : > { %v897_v5 = vmax.f32 %v895_v3, 0.0  ;;  %v1637_v3 = vld [vmem:[#allocation9] sm:$0xff] }
 0x1e4   : > { %v900_v6 = vmin.f32 %v898_v4, 6.0  ;;  %v1638_v4 = vld [vmem:[#allocation9 + $0x8] sm:$0xff] }
 0x1e5   : > { %v899_v7 = vmin.f32 %v897_v5, 6.0  ;;  %v3591_v5 = vpack.c.bf16 %v1638_v4, %v1637_v3  ;;  %v1830_v3 = vld [vmem:[#allocation10 + $0x48] sm:$0xff] }
 0x1e6   : > { %903 = vst.msk [vmem:[#allocation2 + $0x9] sm:$0xff] %vm901_vm1, %v900_v6 }
 0x1e7   : > { %902 = vst.msk [vmem:[#allocation2 + $0x1] sm:$0xff] %vm901_vm1, %v899_v7 }
 0x1ed   : > { %v1081_v26 = vld [vmem:[#allocation2 + $0xa] sm:$0xff] }
 0x1ee   : > { %v916_v10 = vld [vmem:[#allocation2] sm:$0xff]  ;;  %v917_v11 = vld [vmem:[#allocation2 + $0x8] sm:$0xff] }
 0x1ef   : > { %3179 = vmatprep.mubr.msk.f32.mxu1 %vm901_vm1, %v916_v10  ;;  %v1080_v21 = vld [vmem:[#allocation2 + $0x2] sm:$0xff]  ;;  %v2912_v10 = vld [vmem:[%s5094_s2] ss:$0 sm:$0xff]  ;;  %s5102_s2 = sshll.u32 %s4557_s6, 4 }
 0x1f0   : > { %3180 = vmatmul.mubr.msk.f32.vlgmr.msra.gmra.mrb[0].mxu1 %vm901_vm1, %v917_v11  ;;  %s788_s22 = scalar_lea.vmem [#allocation16], %s5102_s2 }
 0x1f1   : > { %3514 = vmatpush3.bf16.msra.mxu1 %v4654_v35  ;;  %3190 = vmatprep.mubr.msk.f32.mxu1 %vm901_vm1, %v899_v7  ;;  %v1724_v35 = vld [vmem:[%s5022_s11 + $0x38] sm:$0xff] }
 0x1f2   : > { %3516 = vmatprep.subr.bf16.mxu1 %v3515_v12  ;;  %v3611_v36 = vpack.c.bf16 %v1724_v35, %v1723_v34  ;;  %v1824_v34 = vld [vmem:[#allocation10 + $0x18] sm:$0xff] }
 0x1f3   : > { %v3619_v35 = vpack.c.bf16 %v1824_v34, %v1823_v33 }
 0x1f4   : > { %3612 = vmatprep.subr.bf16.mxu0 %v3611_v36 }
 0x1f5   : > { %3518 = vmatpush3.bf16.msra.mxu1 %v3515_v12  ;;  %3614 = vmatpush3.bf16.msra.mxu0 %v3611_v36  ;;  %v1825_v36 = vld [vmem:[#allocation10 + $0x20] sm:$0xff] }
 0x1f6   : > { %3520 = vmatprep.subr.bf16.mxu1 %v3519_v15  ;;  %v3623_v38 = vpack.c.bf16 %v1826_v37, %v1825_v36  ;;  %v2274_v37 = vld [vmem:[#allocation13 + $0x10] sm:$0xff] }
 0x1f8   : > { %3191 = vmatmul.mubr.msk.f32.vlgmr.msra.gmra.mrb[0].mxu1 %vm901_vm1, %v900_v6 }
 0x1f9   : > { %3522 = vmatpush3.bf16.msra.mxu1 %v3519_v15  ;;  %3201 = vmatprep.mubr.msk.f32.mxu1 %vm901_vm1, %v1080_v21 }
 0x1fa   : > { %3524 = vmatprep.subr.bf16.mxu1 %v3523_v18 }
 0x1fd   : > { %3526 = vmatpush3.bf16.msra.mxu1 %v3523_v18 }
 0x1fe   : > { %3528 = vmatprep.subr.bf16.mxu1 %v3527_v22 }
 0x1ff   : > { %v3249_v47 = vpop.f32.mrb[2].mxu0 }
 0x200   : > { %3202 = vmatmul.mubr.msk.f32.vlgmr.msra.gmra.mrb[0].mxu1 %vm901_vm1, %v1081_v26  ;;  %v1356_v48 = vadd.f32 %v3249_v47, %v2915_v46  ;;  %v1340_v49 = vpop.f32.mrb[3].mxu0  ;;  %v2097_v26 = vld [vmem:[#allocation12 + $0x10] sm:$0xff] }
 0x201   : > { %3530 = vmatpush3.bf16.msra.mxu1 %v3527_v22  ;;  %3212 = vmatprep.mubr.msk.f32.mxu1 %vm901_vm1, %v899_v7  ;;  %v1355_v50 = vadd.f32 %v2915_v46, %v1340_v49  ;;  %v1640_v7 = vld [vmem:[#allocation9 + $0x18] sm:$0xff]  ;;  %v3643_v28 = vpack.c.bf16 %v2098_v27, %v2097_v26  ;;  %v2934_v27 = vld [vmem:[%s5098_s26] ss:$0 sm:$0xff]  ;;  %s5103_s26 = sld [smem:[#allocation38_spill]] }
 0x202   : > { %3532 = vmatprep.subr.bf16.mxu1 %v3531_v25  ;;  %v1358_v51 = vmax.f32 %v1356_v48, 0.0 }
 0x203   : > { %v1357_v52 = vmax.f32 %v1355_v50, 0.0 }
 0x204   : > { %v1360_v53 = vmin.f32 %v1358_v51, 6.0 }
 0x205   : > { %3534 = vmatpush3.bf16.msra.mxu1 %v3531_v25  ;;  %v1359_v54 = vmin.f32 %v1357_v52, 6.0  ;;  %v3639_v25 = vpack.c.bf16 %v2096_v24, %v2095_v23  ;;  %v2927_v52 = vld [vmem:[%s5096_s19] ss:$0 sm:$0xff]  ;;  %v2273_v23 = vld [vmem:[#allocation13 + $0x8] sm:$0xff] }
 0x206   : > { %3568 = vmatprep.subr.bf16.mxu1 %v3567_v39  ;;  %1362 = vst.msk [vmem:[#allocation2 + $0x9] sm:$0xff] %vm901_vm1, %v1360_v53 }
 0x207   : > { %1361 = vst.msk [vmem:[#allocation2 + $0x1] sm:$0xff] %vm901_vm1, %v1359_v54  ;;  %3640 = vmatprep.subr.bf16.mxu0 %v3639_v25 }
 0x208   : > { %3213 = vmatmul.mubr.msk.f32.vlgmr.msra.gmra.mrb[2].mxu1 %vm901_vm1, %v900_v6  ;;  %v1639_v6 = vld [vmem:[#allocation9 + $0x10] sm:$0xff] }
 0x209   : > { %3570 = vmatpush3.bf16.msra.mxu1 %v3567_v39  ;;  %v3595_v9 = vpack.c.bf16 %v1640_v7, %v1639_v6  ;;  %v2922_v39 = vld [vmem:[%s5095_s16] ss:$0 sm:$0xff]  ;;  %v1832_v6 = vld [vmem:[#allocation10 + $0x58] sm:$0xff]  ;;  %s2754_s16 = sshll.u32 %s788_s22, 4  ;;  %s4962_s16 = int_to_ptr.vmem [resolvable:$true] %s2754_s16 }
 0x20a   : > { %3572 = vmatprep.subr.bf16.mxu1 %v3571_v42  ;;  %s4073_s2 = scalar_lea.vmem %s4962_s16, 256  ;;  %p4080_p13 = scmp.lt.s32.totalorder %s4962_s16, %s4078_s7 }
 0x20b   : > { %p4074_p6 = scmp.ne.s32.totalorder %s4962_s16, %s4073_s2  ;;  %p4081_p0 = scmp.lt.s32.totalorder %s4079_s8, %s4073_s2 }
 0x20d   : > { %3574 = vmatpush3.bf16.msra.mxu1 %v3571_v42  ;;  %v1540_v8 = vld [vmem:[#allocation2 + $0xa] sm:$0xff]  ;;  %p4075_p12 = pnand %p4074_p6, %p5104_p9  ;;  %p4082_p2 = por %p4081_p0, %p4080_p13 }
 0x20e   : > { %3576 = vmatprep.subr.bf16.mxu1 %v3575_v45  ;;  %v1375_v57 = vld [vmem:[#allocation2] sm:$0xff]  ;;  %v1376_v58 = vld [vmem:[#allocation2 + $0x8] sm:$0xff] }
 0x20f   : > { %3258 = vmatprep.mubr.msk.f32.mxu1 %vm901_vm1, %v1375_v57  ;;  %v1539_v2 = vld [vmem:[#allocation2 + $0x2] sm:$0xff]  ;;  %p4076_p1 = pneg %p4075_p12 }
 0x210   : > { %3259 = vmatmul.mubr.msk.f32.vlgmr.msra.gmra.mrb[4].mxu1 %vm901_vm1, %v1376_v58 }
 0x211   : > { %3578 = vmatpush3.bf16.msra.mxu1 %v3575_v45  ;;  %3269 = vmatprep.mubr.msk.f32.mxu1 %vm901_vm1, %v1359_v54  ;;  %p4083_p8 = pnand %p4082_p2, %p4076_p1 }
 0x212   : > { %3580 = vmatprep.subr.bf16.mxu1 %v3579_v59 }
 0x215   : > { %3582 = vmatpush3.bf16.msra.mxu1 %v3579_v59 }
 0x216   : > { %3584 = vmatprep.subr.bf16.mxu1 %v3583_v62 }
 0x218   : > { %3270 = vmatmul.mubr.msk.f32.vlgmr.msra.gmra.mrb[4].mxu1 %vm901_vm1, %v1360_v53 }
 0x219   : > { %3586 = vmatpush3.bf16.msra.mxu1 %v3583_v62  ;;  %3280 = vmatprep.mubr.msk.f32.mxu1 %vm901_vm1, %v1539_v2  ;;  %v1828_v62 = vld [vmem:[#allocation10 + $0x38] sm:$0xff]  ;;  %v1829_v2 = vld [vmem:[#allocation10 + $0x40] sm:$0xff] }
 0x21a   : > { %3588 = vmatprep.subr.bf16.mxu1 %v3587_v1  ;;  %v3631_v4 = vpack.c.bf16 %v1830_v3, %v1829_v2  ;;  %v2373_v2 = vld [vmem:[%s5099_s9 + $0x20] sm:$0xff]  ;;  %v2374_v3 = vld [vmem:[%s5099_s9 + $0x28] sm:$0xff] }
 0x21d   : > { %3590 = vmatpush3.bf16.msra.mxu1 %v3587_v1  ;;  %v3627_v1 = vpack.c.bf16 %v1828_v62, %v1827_v61  ;;  %v2372_v61 = vld [vmem:[%s5099_s9 + $0x18] sm:$0xff] }
 0x21e   : > { %3592 = vmatprep.subr.bf16.mxu1 %v3591_v5 }
 0x220   : > { %3281 = vmatmul.mubr.msk.f32.vlgmr.msra.gmra.mrb[4].mxu1 %vm901_vm1, %v1540_v8 }
 0x221   : > { %3594 = vmatpush3.bf16.msra.mxu1 %v3591_v5  ;;  %3291 = vmatprep.mubr.msk.f32.mxu1 %vm901_vm1, %v1359_v54  ;;  %v1831_v5 = vld [vmem:[#allocation10 + $0x50] sm:$0xff] }
 0x222   : > { %3596 = vmatprep.subr.bf16.mxu1 %v3595_v9  ;;  %v3635_v7 = vpack.c.bf16 %v1832_v6, %v1831_v5  ;;  %v2375_v5 = vld [vmem:[%s5099_s9 + $0x30] sm:$0xff]  ;;  %v2376_v6 = vld [vmem:[%s5099_s9 + $0x38] sm:$0xff] }
 0x225   : > { %3598 = vmatpush3.bf16.msra.mxu1 %v3595_v9 }
 0x226   : > { %3616 = vmatprep.subr.bf16.mxu1 %v3615_v32 }
 0x228   : > { %3292 = vmatmul.mubr.msk.f32.vlgmr.msra.gmra.mrb[6].mxu1 %vm901_vm1, %v1360_v53 }
 0x229   : > { %3618 = vmatpush3.bf16.msra.mxu1 %v3615_v32 }
 0x22a   : > { %3620 = vmatprep.subr.bf16.mxu1 %v3619_v35 }
 0x22d   : > { %3622 = vmatpush3.bf16.msra.mxu1 %v3619_v35 }
 0x22e   : > { %3624 = vmatprep.subr.bf16.mxu1 %v3623_v38 }
 0x2d3   : > { %v3203_v11 = vpop.f32.mrb[0].mxu1 }
 0x2d4   : > { %v1173_v12 = vadd.f32 %v3203_v11, %v2912_v10  ;;  %v1154_v13 = vpop.f32.mrb[1].mxu1  ;;  %v2176_v11 = vld [vmem:[%s5097_s0 + $0x8] sm:$0xff] }
 0x2d5   : > { %v1172_v14 = vadd.f32 %v2912_v10, %v1154_v13  ;;  %v2175_v10 = vld [vmem:[%s5097_s0] sm:$0xff] }
 0x2d6   : > { %v1175_v15 = vmax.f32 %v1173_v12, 0.0  ;;  %v2177_v12 = vld [vmem:[%s5097_s0 + $0x10] sm:$0xff]  ;;  %v3647_v13 = vpack.c.bf16 %v2176_v11, %v2175_v10  ;;  %v2939_v10 = vld [vmem:[%s5100_s1] ss:$0 sm:$0xff] }
 0x2d7   : > { %v1174_v16 = vmax.f32 %v1172_v14, 0.0  ;;  %v2178_v14 = vld [vmem:[%s5097_s0 + $0x18] sm:$0xff] }
 0x2d8   : > { %v1177_v17 = vmin.f32 %v1175_v15, 6.0  ;;  %v3651_v15 = vpack.c.bf16 %v2178_v14, %v2177_v12 }
 0x2d9   : > { %v1176_v18 = vmin.f32 %v1174_v16, 6.0  ;;  %v2179_v16 = vld [vmem:[%s5097_s0 + $0x20] sm:$0xff] }
 0x2db   : > { %v3214_v19 = vpop.f32.mrb[2].mxu1 }
 0x2dc   : > { %v1254_v20 = vadd.f32 %v3214_v19, %v1177_v17  ;;  %v1248_v21 = vpop.f32.mrb[3].mxu1  ;;  %v2180_v17 = vld [vmem:[%s5097_s0 + $0x28] sm:$0xff]  ;;  %v2181_v19 = vld [vmem:[%s5097_s0 + $0x30] sm:$0xff] }
 0x2dd   : > { %v1249_v22 = vadd.f32 %v1248_v21, %v1176_v18  ;;  %v3655_v18 = vpack.c.bf16 %v2180_v17, %v2179_v16 }
 0x2df   : > { %3310 = vmatprep.mubr.msk.f32.mxu0 %vm1725_vm2, %v1249_v22  ;;  %v2272_v22 = vld [vmem:[#allocation13] sm:$0xff] }
 0x2e0   : > { %3311 = vmatmul.mubr.msk.f32.vlgmr.msra.gmra.mrb[4].mxu0 %vm1725_vm2, %v1254_v20  ;;  %v2182_v20 = vld [vmem:[%s5097_s0 + $0x38] sm:$0xff]  ;;  %v3663_v24 = vpack.c.bf16 %v2273_v23, %v2272_v22  ;;  %s4967_s0 = scalar_lea.hbm %s5103_s26, %s2957_s18 }
 0x2e1   : > { %3642 = vmatpush3.bf16.msra.mxu0 %v3639_v25  ;;  %v3659_v21 = vpack.c.bf16 %v2182_v20, %v2181_v19  ;;  %v2379_v19 = vld [vmem:[%s5099_s9 + $0x50] sm:$0xff]  ;;  %v2380_v20 = vld [vmem:[%s5099_s9 + $0x58] sm:$0xff] }
 0x2e2   : > { %3644 = vmatprep.subr.bf16.mxu0 %v3643_v28  ;;  %v3699_v23 = vpack.c.bf16 %v2380_v20, %v2379_v19 }
 0x2e5   : > { %3646 = vmatpush3.bf16.msra.mxu0 %v3643_v28 }
 0x2e6   : > { %3648 = vmatprep.subr.bf16.mxu0 %v3647_v13 }
 0x2f3   : > { %v3282_v40 = vpop.f32.mrb[4].mxu1 }
 0x2f4   : > { %v1632_v41 = vadd.f32 %v3282_v40, %v2922_v39  ;;  %v1613_v42 = vpop.f32.mrb[5].mxu1 }
 0x2f5   : > { %v1631_v43 = vadd.f32 %v2922_v39, %v1613_v42  ;;  %v2276_v42 = vld [vmem:[#allocation13 + $0x20] sm:$0xff] }
 0x2f6   : > { %v1634_v44 = vmax.f32 %v1632_v41, 0.0 }
 0x2f7   : > { %v1633_v45 = vmax.f32 %v1631_v43, 0.0  ;;  %v2277_v43 = vld [vmem:[#allocation13 + $0x28] sm:$0xff] }
 0x2f8   : > { %v1636_v46 = vmin.f32 %v1634_v44, 6.0  ;;  %v3671_v44 = vpack.c.bf16 %v2277_v43, %v2276_v42  ;;  %v2392_v42 = vld [vmem:[%s5099_s9 + $0xb8] sm:$0xff] }
 0x2f9   : > { %v1635_v47 = vmin.f32 %v1633_v45, 6.0  ;;  %v2278_v45 = vld [vmem:[#allocation13 + $0x30] sm:$0xff] }
 0x2fb   : > { %v3293_v48 = vpop.f32.mrb[6].mxu1 }
 0x2fc   : > { %v4819_v49 = vadd.f32 %v3293_v48, %v1636_v46  ;;  %v1707_v50 = vpop.f32.mrb[7].mxu1  ;;  %v2279_v46 = vld [vmem:[#allocation13 + $0x38] sm:$0xff]  ;;  %v2655_v48 = vld [vmem:[#allocation15] sm:$0xff] }
 0x2fd   : > { %v4821_v51 = vadd.f32 %v1707_v50, %v1635_v47  ;;  %v3675_v47 = vpack.c.bf16 %v2279_v46, %v2278_v45  ;;  %v2656_v50 = vld [vmem:[#allocation15 + $0x8] sm:$0xff] }
 0x3b3   : > { %v3312_v53 = vpop.f32.mrb[4].mxu0 }
 0x3b4   : > { %v1814_v54 = vadd.f32 %v3312_v53, %v2927_v52  ;;  %v1798_v55 = vpop.f32.mrb[5].mxu0  ;;  %v2657_v53 = vld [vmem:[#allocation15 + $0x10] sm:$0xff] }
 0x3b5   : > { %v1813_v56 = vadd.f32 %v2927_v52, %v1798_v55  ;;  %v3727_v52 = vpack.c.bf16 %v2656_v50, %v2655_v48 }
 0x3b6   : > { %v1816_v57 = vmax.f32 %v1814_v54, 0.0  ;;  %v2658_v54 = vld [vmem:[#allocation15 + $0x18] sm:$0xff] }
 0x3b7   : > { %v1815_v58 = vmax.f32 %v1813_v56, 0.0  ;;  %v3731_v55 = vpack.c.bf16 %v2658_v54, %v2657_v53  ;;  %v2370_v56 = vld [vmem:[%s5099_s9 + $0x8] sm:$0xff] }
 0x3b8   : > { %v1818_v59 = vmin.f32 %v1816_v57, 6.0 }
 0x3b9   : > { %v1817_v60 = vmin.f32 %v1815_v58, 6.0  ;;  %v2659_v58 = vld [vmem:[#allocation15 + $0x20] sm:$0xff] }
 0x3ba   : > { %1820 = vst.msk [vmem:[#allocation2 + $0x9] sm:$0xff] %vm901_vm1, %v1818_v59 }
 0x3bb   : > { %1819 = vst.msk [vmem:[#allocation2 + $0x1] sm:$0xff] %vm901_vm1, %v1817_v60  ;;  %3354 = vmatprep.mubr.msk.f32.mxu0 %vm901_vm1, %v1817_v60 }
 0x3bc   : > { %3355 = vmatmul.mubr.msk.f32.vlgmr.msra.gmra.mrb[6].mxu0 %vm901_vm1, %v1818_v59 }
 0x3bd   : > { %3650 = vmatpush3.bf16.msra.mxu0 %v3647_v13 }
 0x3be   : > { %3652 = vmatprep.subr.bf16.mxu0 %v3651_v15 }
 0x3c1   : > { %v1998_v9 = vld [vmem:[#allocation2 + $0xa] sm:$0xff]  ;;  %3654 = vmatpush3.bf16.msra.mxu0 %v3651_v15 }
 0x3c2   : > { %v1833_v63 = vld [vmem:[#allocation2] sm:$0xff]  ;;  %v1834_v0 = vld [vmem:[#allocation2 + $0x8] sm:$0xff]  ;;  %3656 = vmatprep.subr.bf16.mxu0 %v3655_v18 }
 0x3c3   : > { %3321 = vmatprep.mubr.msk.f32.mxu1 %vm901_vm1, %v1833_v63  ;;  %v1997_v8 = vld [vmem:[#allocation2 + $0x2] sm:$0xff] }
 0x3c4   : > { %3322 = vmatmul.mubr.msk.f32.vlgmr.msra.gmra.mrb[8].mxu1 %vm901_vm1, %v1834_v0  ;;  %v2661_v63 = vld [vmem:[#allocation15 + $0x30] sm:$0xff]  ;;  %v2662_v0 = vld [vmem:[#allocation15 + $0x38] sm:$0xff] }
 0x3c5   : > { %3626 = vmatpush3.bf16.msra.mxu1 %v3623_v38  ;;  %3332 = vmatprep.mubr.msk.f32.mxu1 %vm901_vm1, %v1817_v60  ;;  %v2275_v38 = vld [vmem:[#allocation13 + $0x18] sm:$0xff] }
 0x3c6   : > { %3628 = vmatprep.subr.bf16.mxu1 %v3627_v1  ;;  %3658 = vmatpush3.bf16.msra.mxu0 %v3655_v18  ;;  %v3667_v41 = vpack.c.bf16 %v2275_v38, %v2274_v37  ;;  %v2389_v37 = vld [vmem:[%s5099_s9 + $0xa0] sm:$0xff]  ;;  %v2390_v38 = vld [vmem:[%s5099_s9 + $0xa8] sm:$0xff] }
 0x3c7   : > { %3660 = vmatprep.subr.bf16.mxu0 %v3659_v21 }
 0x3c9   : > { %3630 = vmatpush3.bf16.msra.mxu1 %v3627_v1  ;;  %v3739_v1 = vpack.c.bf16 %v2662_v0, %v2661_v63 }
 0x3ca   : > { %3632 = vmatprep.subr.bf16.mxu1 %v3631_v4  ;;  %3662 = vmatpush3.bf16.msra.mxu0 %v3659_v21 }
 0x3cb   : > { %3664 = vmatprep.subr.bf16.mxu0 %v3663_v24 }
 0x3cc   : > { %3333 = vmatmul.mubr.msk.f32.vlgmr.msra.gmra.mrb[8].mxu1 %vm901_vm1, %v1818_v59  ;;  %v2660_v59 = vld [vmem:[#allocation15 + $0x28] sm:$0xff] }
 0x3cd   : > { %3634 = vmatpush3.bf16.msra.mxu1 %v3631_v4  ;;  %3343 = vmatprep.mubr.msk.f32.mxu1 %vm901_vm1, %v1997_v8  ;;  %v3735_v60 = vpack.c.bf16 %v2660_v59, %v2659_v58  ;;  %v3687_v4 = vpack.c.bf16 %v2374_v3, %v2373_v2  ;;  %v2377_v8 = vld [vmem:[%s5099_s9 + $0x40] sm:$0xff] }
 0x3ce   : > { %3636 = vmatprep.subr.bf16.mxu1 %v3635_v7 }
 0x3d1   : > { %3638 = vmatpush3.bf16.msra.mxu1 %v3635_v7  ;;  %v3691_v7 = vpack.c.bf16 %v2376_v6, %v2375_v5 }
 0x3d4   : > { %3344 = vmatmul.mubr.msk.f32.vlgmr.msra.gmra.mrb[8].mxu1 %vm901_vm1, %v1998_v9  ;;  %v3695_v9 = vpack.c.bf16 %v2378_v29, %v2377_v8 }
 0x48f   : > { %v3356_v25 = vpop.f32.mrb[6].mxu0 }
 0x490   : > { %v2165_v26 = vpop.f32.mrb[7].mxu0 }
 0x4a7   : > { %v3345_v28 = vpop.f32.mrb[8].mxu1 }
 0x4a8   : > { %v2090_v30 = vadd.f32 %v3345_v28, %v2934_v27  ;;  %v2071_v31 = vpop.f32.mrb[9].mxu1  ;;  %v2384_v28 = vld [vmem:[%s5099_s9 + $0x78] sm:$0xff] }
 0x4a9   : > { %v2089_v32 = vadd.f32 %v2934_v27, %v2071_v31  ;;  %v2383_v27 = vld [vmem:[%s5099_s9 + $0x70] sm:$0xff]  ;;  %v2385_v31 = vld [vmem:[%s5099_s9 + $0x80] sm:$0xff] }
 0x4aa   : > { %v2092_v33 = vmax.f32 %v2090_v30, 0.0  ;;  %v3707_v30 = vpack.c.bf16 %v2384_v28, %v2383_v27 }
 0x4ab   : > { %v2091_v34 = vmax.f32 %v2089_v32, 0.0  ;;  %v2386_v32 = vld [vmem:[%s5099_s9 + $0x88] sm:$0xff] }
 0x4ac   : > { %v2094_v35 = vmin.f32 %v2092_v33, 6.0  ;;  %v3711_v33 = vpack.c.bf16 %v2386_v32, %v2385_v31 }
 0x4ad   : > { %v2093_v36 = vmin.f32 %v2091_v34, 6.0  ;;  %v2387_v34 = vld [vmem:[%s5099_s9 + $0x90] sm:$0xff] }
 0x4ae   : > { %v2171_v39 = vadd.f32 %v3356_v25, %v2094_v35  ;;  %v2382_v25 = vld [vmem:[%s5099_s9 + $0x68] sm:$0xff]  ;;  %v2388_v35 = vld [vmem:[%s5099_s9 + $0x98] sm:$0xff] }
 0x4af   : > { %v2166_v40 = vadd.f32 %v2165_v26, %v2093_v36  ;;  %v3715_v36 = vpack.c.bf16 %v2388_v35, %v2387_v34 }
 0x4b1   : > { %3373 = vmatprep.mubr.msk.f32.mxu0 %vm1725_vm2, %v2166_v40  ;;  %v3719_v40 = vpack.c.bf16 %v2390_v38, %v2389_v37 }
 0x4b2   : > { %3374 = vmatmul.mubr.msk.f32.vlgmr.msra.gmra.mrb[8].mxu0 %vm1725_vm2, %v2171_v39 }
 0x4b3   : > { %3666 = vmatpush3.bf16.msra.mxu0 %v3663_v24  ;;  %3392 = vmatprep.mubr.msk.f32.mxu0 %vm1725_vm2, %v4821_v51  ;;  %v2369_v51 = vld [vmem:[%s5099_s9] sm:$0xff] }
 0x4b4   : > { %3668 = vmatprep.subr.bf16.mxu0 %v3667_v41  ;;  %v3679_v57 = vpack.c.bf16 %v2370_v56, %v2369_v51  ;;  %v2381_v24 = vld [vmem:[%s5099_s9 + $0x60] sm:$0xff] }
 0x4b5   : > { %v3703_v26 = vpack.c.bf16 %v2382_v25, %v2381_v24 }
 0x4b6   : > { %3680 = vmatprep.subr.bf16.mxu1 %v3679_v57 }
 0x4b7   : > { %3670 = vmatpush3.bf16.msra.mxu0 %v3667_v41  ;;  %3682 = vmatpush3.bf16.msra.mxu1 %v3679_v57  ;;  %v2391_v41 = vld [vmem:[%s5099_s9 + $0xb0] sm:$0xff] }
 0x4b8   : > { %3672 = vmatprep.subr.bf16.mxu0 %v3671_v44  ;;  %v3723_v43 = vpack.c.bf16 %v2392_v42, %v2391_v41 }
 0x4bb   : > { %3674 = vmatpush3.bf16.msra.mxu0 %v3671_v44 }
 0x4bc   : > { %3676 = vmatprep.subr.bf16.mxu0 %v3675_v47 }
 0x4bf   : > { %3678 = vmatpush3.bf16.msra.mxu0 %v3675_v47  ;;  %v2948_v47 = vld [vmem:[%s5101_s4] ss:$0 sm:$0xff]  ;;  %s2741_s4 = scalar_lea.sflag [#allocation6], %s4557_s6 }
 0x4c0   : > { %3728 = vmatprep.subr.bf16.mxu0 %v3727_v52 }
 0x4c2   : > { %3393 = vmatmul.mubr.msk.f32.vlgmr.msra.gmra.mrb[8].mxu0 %vm1725_vm2, %v4819_v49  ;;  %v2371_v49 = vld [vmem:[%s5099_s9 + $0x10] sm:$0xff] }
 0x4c3   : > { %3730 = vmatpush3.bf16.msra.mxu0 %v3727_v52  ;;  %v3683_v62 = vpack.c.bf16 %v2372_v61, %v2371_v49 }
 0x4c4   : > { %3732 = vmatprep.subr.bf16.mxu0 %v3731_v55 }
 0x4c5   : > { %3684 = vmatprep.subr.bf16.mxu1 %v3683_v62 }
 0x4c6   : > { %3686 = vmatpush3.bf16.msra.mxu1 %v3683_v62 }
 0x4c7   : > { %3734 = vmatpush3.bf16.msra.mxu0 %v3731_v55  ;;  %3688 = vmatprep.subr.bf16.mxu1 %v3687_v4 }
 0x4c8   : > { %3736 = vmatprep.subr.bf16.mxu0 %v3735_v60 }
 0x4ca   : > { %3690 = vmatpush3.bf16.msra.mxu1 %v3687_v4 }
 0x4cb   : > { %3738 = vmatpush3.bf16.msra.mxu0 %v3735_v60  ;;  %3692 = vmatprep.subr.bf16.mxu1 %v3691_v7 }
 0x4cc   : > { %3740 = vmatprep.subr.bf16.mxu0 %v3739_v1 }
 0x4ce   : > { %3694 = vmatpush3.bf16.msra.mxu1 %v3691_v7 }
 0x4cf   : > { %3742 = vmatpush3.bf16.msra.mxu0 %v3739_v1  ;;  %3696 = vmatprep.subr.bf16.mxu1 %v3695_v9 }
 0x595   : > { %v3394_v11 = vpop.f32.mrb[8].mxu0 }
 0x596   : > { %v3743_v12 = vadd.f32 %v3394_v11, %v2939_v10  ;;  %v2352_v13 = vpop.f32.mrb[9].mxu0 }
 0x597   : > { %v3744_v14 = vadd.f32 %v2939_v10, %v2352_v13 }
 0x598   : > { %v2364_v15 = vmax.f32 %v3743_v12, 0.0 }
 0x599   : > { %v2363_v16 = vmax.f32 %v3744_v14, 0.0 }
 0x59a   : > { %v2366_v17 = vmin.f32 %v2364_v15, 6.0 }
 0x59b   : > { %v2365_v18 = vmin.f32 %v2363_v16, 6.0 }
 0x59c   : > { %2368 = vst.msk [vmem:[#allocation3 + $0x9] sm:$0xff] %vm1725_vm2, %v2366_v17 }
 0x59d   : > { %2367 = vst.msk [vmem:[#allocation3 + $0x1] sm:$0xff] %vm1725_vm2, %v2365_v18  ;;  %3468 = vmatprep.mubr.msk.f32.mxu0 %vm1725_vm2, %v2365_v18 }
 0x59e   : > { %3469 = vmatmul.mubr.msk.f32.vlgmr.msra.gmra.mrb[10].mxu0 %vm1725_vm2, %v2366_v17 }
 0x5a3   : > { %v2558_v44 = vld [vmem:[#allocation3 + $0xa] sm:$0xff] }
 0x5a4   : > { %v2393_v21 = vld [vmem:[#allocation3] sm:$0xff]  ;;  %v2394_v22 = vld [vmem:[#allocation3 + $0x8] sm:$0xff] }
 0x5a5   : > { %3411 = vmatprep.mubr.msk.f32.mxu1 %vm1725_vm2, %v2393_v21  ;;  %v2557_v39 = vld [vmem:[#allocation3 + $0x2] sm:$0xff] }
 0x5a6   : > { %3412 = vmatmul.mubr.msk.f32.vlgmr.msra.gmra.mrb[10].mxu1 %vm1725_vm2, %v2394_v22 }
 0x5a7   : > { %3698 = vmatpush3.bf16.msra.mxu1 %v3695_v9  ;;  %3430 = vmatprep.mubr.msk.f32.mxu1 %vm1725_vm2, %v2365_v18 }
 0x5a8   : > { %3700 = vmatprep.subr.bf16.mxu1 %v3699_v23 }
 0x5ab   : > { %3702 = vmatpush3.bf16.msra.mxu1 %v3699_v23 }
 0x5ac   : > { %3704 = vmatprep.subr.bf16.mxu1 %v3703_v26 }
 0x5af   : > { %3706 = vmatpush3.bf16.msra.mxu1 %v3703_v26 }
 0x5b0   : > { %3708 = vmatprep.subr.bf16.mxu1 %v3707_v30 }
 0x5b3   : > { %3710 = vmatpush3.bf16.msra.mxu1 %v3707_v30 }
 0x5b4   : > { %3712 = vmatprep.subr.bf16.mxu1 %v3711_v33 }
 0x5b6   : > { %3431 = vmatmul.mubr.msk.f32.vlgmr.msra.gmra.mrb[10].mxu1 %vm1725_vm2, %v2366_v17 }
 0x5b7   : > { %3714 = vmatpush3.bf16.msra.mxu1 %v3711_v33  ;;  %3449 = vmatprep.mubr.msk.f32.mxu1 %vm1725_vm2, %v2557_v39 }
 0x5b8   : > { %3716 = vmatprep.subr.bf16.mxu1 %v3715_v36 }
 0x5bb   : > { %3718 = vmatpush3.bf16.msra.mxu1 %v3715_v36 }
 0x5bc   : > { %3720 = vmatprep.subr.bf16.mxu1 %v3719_v40 }
 0x5bf   : > { %3722 = vmatpush3.bf16.msra.mxu1 %v3719_v40 }
 0x5c0   : > { %3724 = vmatprep.subr.bf16.mxu1 %v3723_v43 }
 0x5c3   : > { %3726 = vmatpush3.bf16.msra.mxu1 %v3723_v43 }
 0x5c6   : > { %3450 = vmatmul.mubr.msk.f32.vlgmr.msra.gmra.mrb[10].mxu1 %vm1725_vm2, %v2558_v44 }
 0x671   : > { %v3470_v45 = vpop.f32.mrb[10].mxu0 }
 0x672   : > { %v2729_v46 = vpop.f32.mrb[11].mxu0 }
 0x699   : > { %v3451_v48 = vpop.f32.mrb[10].mxu1 }
 0x69a   : > { %v2650_v50 = vadd.f32 %v3451_v48, %v2948_v47  ;;  %v2631_v52 = vpop.f32.mrb[11].mxu1 }
 0x69b   : > { %v2649_v53 = vadd.f32 %v2948_v47, %v2631_v52 }
 0x69c   : > { %v2652_v54 = vmax.f32 %v2650_v50, 0.0 }
 0x69d   : > { %v2651_v55 = vmax.f32 %v2649_v53, 0.0 }
 0x69e   : > { %v2654_v51 = vmin.f32 %v2652_v54, 6.0 }
 0x69f   : > { %v2653_v56 = vmin.f32 %v2651_v55, 6.0 }
 0x6a0   : > { %v2735_v57 = vadd.f32 %v3470_v45, %v2654_v51 }
 0x6a1   : > { %v2730_v58 = vadd.f32 %v2729_v46, %v2653_v56 }
 0x6a2   : > { %2739 = vst [vmem:[%s788_s22 + $0x8] sm:$0xff] %v2735_v57 }
 0x6a3   : > { %2738 = vst [vmem:[%s788_s22] sm:$0xff] %v2730_v58 }
 0x6a4   : > { %4086 = shalt.err (!%p4083_p8)
}
 0x6a5   : > { %s4087_s22 = scalar_lea.hbm %s4967_s0, 256  ;;  %s4091_s19 = scalar_lea.hbm %s5103_s26, 512 }
 0x6a6   : > { %p4088_p4 = scmp.ne.s32.totalorder %s4967_s0, %s4087_s22  ;;  %p4092_p3 = scmp.lt.u32.totalorder %s4967_s0, %s5103_s26 }
 0x6a7   : > { %p4093_p5 = scmp.lt.u32.totalorder %s4091_s19, %s4087_s22  ;;  %p4095_p6 = scmp.lt.u32.totalorder %s4087_s22, %s4967_s0 }
 0x6a8   : > { %p4089_p10 = pnand %p4088_p4, %p5104_p9 }
 0x6a9   : > { %p4094_p7 = por %p4093_p5, %p4092_p3 }
 0x6aa   : > { %p4090_p11 = pneg %p4089_p10 }
 0x6ab   : > { %p4096_p12 = por %p4095_p6, %p4094_p7 }
 0x6ad   : > { %p4097_p1 = pnand %p4096_p12, %p4090_p11 }
 0x6af   : > { %4100 = shalt.err (!%p4097_p1)
}
 0x6b0   : > { %s4164_s8 = smov 128   ;;  %s4165_s2 = smov 8  }
 0x6b1   : > { %3789 = dma.vmem_to_hbm [thread:$0]  (%p5104_p9), %s4962_s16, 256, %s4967_s0, %s2741_s4, %s4164_s8, %s4164_s8, %s4165_s2  }
 0x6b2 PF: > { %s2769_s18 = sand.u32 1, %s4139_s3   ;;  %p5105_p13 = scmp.ne.s32.totalorder %s5076_s25, 0 }
 0x6b3   : > { %p5106_p0 = scmp.ge.s32.totalorder %s4151_s30, 2  ;;  %s2770_s22 = scalar_lea.sflag [#allocation6], %s2769_s18 }
 0x6b5   : > { %p3815_p2 = pnand %p5106_p0, %p5105_p13 }
 0x6b7   : > { %4134 = dma.done.wait (!%p3815_p2), %s2770_s22, 256  }
 0x6b8   : > { %4136 = vsyncadd (!%p3815_p2), %s2770_s22, 4294967040  ;;  %p38_p8 = scmp.ge.s32.totalorder %s4475_s5, 4   ;;  %s5107_s3 = smov %s4143_s28 }
 0x6b9   : > { %s5108_s28 = smov %s4147_s29  ;;  %s5109_s29 = smov %s4486_s12 }
 0x6ba   : > { %s5110_s30 = smov %s4475_s5  ;;  %40 = sbr.rel (!%p38_p8) target bundleno = 26 (0x1a), region = 177 }
 0x6c1   :  { %2775 = vsyncpa [#allocation5], 1 }
 0x6c2   :  { %2777 = vsyncpa [#allocation5 + $0x1], 1 }
 0x6c3   :  { %2778 = vsyncpa [#allocation8], 1 }
 0x6c4   :  { %2779 = vsyncpa [#allocation11], 1 }
 0x6c5   :  { %2780 = vsyncpa [#allocation14], 1 }
 0x6c6   :  { %2781 = vsyncpa [#allocation6], 1 }
 0x6c7   :  { %2783 = vsyncpa [#allocation6 + $0x1], 1 }

</bundles_post_ra>
